<compile_context>
chip_gen: v5e
topology: v5e:2x2
jax: 0.10.0
libtpu: 0.0.40
codegen_flags: <defaults>
</compile_context>

<pallas_src>
import functools

import numpy as np

import jax
import jax.numpy as jnp
from jax.experimental import pallas as pl
from jax.experimental.pallas import tpu as pltpu

# ----------------------------- configuration --------------------------------
DIM = 32                      # embedding dim
NUM_HEADS = 8
HEAD_DIM = DIM // NUM_HEADS   # 4
ALPHA = 0.5
LHEADS = int(NUM_HEADS * ALPHA)          # 4   (global / low-freq heads)
LDIM = LHEADS * HEAD_DIM                 # 16
WINDOW = 2                               # avg-pool window for GAE kv
DILATION = (1, 3)
KERNEL = 3
K2 = KERNEL * KERNEL                     # 9
NUM_DILATION = len(DILATION)             # 2
DCH = DIM // NUM_DILATION                # 16 channels per dilation branch
NHB = DCH // HEAD_DIM                    # 4  heads per dilation branch
H = W = 8
N_PIX = H * W                            # 64
M_PIX = (H // WINDOW) * (W // WINDOW)    # 16 pooled tokens
B_IN = 28                                # forward() reshapes to (4, 7, H, W, C)
B_OUT = 4
GROUP = B_IN // B_OUT                    # 7
DA_SCALE = HEAD_DIM ** (-0.5)            # DA uses un-rounded scale
GAE_SCALE = round(HEAD_DIM ** (-0.5), 3) # ESFF rounds its scale to 3 dp
CLS_IN = N_PIX * (DIM + LDIM)            # 3072
# TODO(synk): the PyTorch module hardcodes classifiers=Linear(75264, 2); that
# only matches a 56x56 feature map, so the classifier here is sized for the
# actual H*W*(dim+ldim) features of these shapes.


# --------------------- constant gather / pooling matrices -------------------
def _build_gather_matrices():
    # g[di, q, j*N + p] = 1  iff pixel q is the j-th dilated neighbour of p
    # (zero column if the neighbour falls into the zero padding, which exactly
    #  reproduces nn.Unfold(kernel, dilation, padding=dilation) semantics).
    g = np.zeros((NUM_DILATION, N_PIX, K2 * N_PIX), np.float32)
    for di, dil in enumerate(DILATION):
        for kh in range(KERNEL):
            for kw in range(KERNEL):
                j = kh * KERNEL + kw
                for y in range(H):
                    for x in range(W):
                        p = y * W + x
                        yy = y + (kh - 1) * dil
                        xx = x + (kw - 1) * dil
                        if 0 <= yy < H and 0 <= xx < W:
                            g[di, yy * W + xx, j * N_PIX + p] = 1.0
    return g


def _build_pool_matrix():
    # m[pooled, p] = 1/4 over each 2x2 window (AvgPool2d(window, stride=window))
    m = np.zeros((M_PIX, N_PIX), np.float32)
    hp, wp = H // WINDOW, W // WINDOW
    inv = 1.0 / (WINDOW * WINDOW)
    for yy in range(hp):
        for xx in range(wp):
            mm = yy * wp + xx
            for dy in range(WINDOW):
                for dx in range(WINDOW):
                    m[mm, (yy * WINDOW + dy) * W + (xx * WINDOW + dx)] = inv
    return m


_GATHER_NP = _build_gather_matrices()      # (2, 64, 576)
_POOL_NP = _build_pool_matrix()            # (16, 64)

# Kernel-internal LAE channel order is d-major (row = d*NHB + h) so the
# head_dim contraction is 4 contiguous sublane slices; canonical order is
# head-major (col = h*HEAD_DIM + d).  These permutations translate.
_BLOCKPERM = np.array([(r % NHB) * HEAD_DIM + r // NHB for r in range(DCH)],
                      dtype=np.int32)
_PROJPERM = np.concatenate([_BLOCKPERM + i * DCH for i in range(NUM_DILATION)])


# ------------------------------- Pallas kernel ------------------------------
def _esff_kernel(x_cm_ref, x_tok_ref, w_main_ref, w_out_ref, b_out_ref,
                 w_lk_ref, w_lv_ref, gather_ref, pool_ref, pool_t_ref,
                 out_ref):
    # ---- group mean over the GROUP=7 inputs forming this output element ----
    xm_cm = x_cm_ref[0]
    xm_tok = x_tok_ref[0]
    for g in range(1, GROUP):
        xm_cm = xm_cm + x_cm_ref[g]
        xm_tok = xm_tok + x_tok_ref[g]
    inv_g = 1.0 / GROUP
    xm_cm = xm_cm * inv_g          # (C, N)  channel-major
    xm_tok = xm_tok * inv_g        # (N, C)  token-major

    # ---- fused projection: [q_d0 | q_d1 | k_d0 v_d0 | k_d1 v_d1 | lq] ----
    pmain = jnp.dot(w_main_ref[...], xm_cm,
                    preferred_element_type=jnp.float32)            # (112, N)

    # ---- LAE: dilated neighbourhood attention, one branch per dilation ----
    lae_blocks = []
    for i in range(NUM_DILATION):
        q_cm = pmain[i * DCH:(i + 1) * DCH, :]                     # (16, N)
        kv_cm = pmain[2 * DCH + 2 * i * DCH:2 * DCH + 2 * (i + 1) * DCH, :]
        # zero-padded dilated unfold as a single matmul with a 0/1 matrix
        kv_unf = jnp.dot(kv_cm, gather_ref[i],
                         preferred_element_type=jnp.float32)       # (32, K2*N)

        s_taps = []
        v_taps = []
        for j in range(K2):
            ku = kv_unf[:DCH, j * N_PIX:(j + 1) * N_PIX]           # (16, N)
            vu = kv_unf[DCH:, j * N_PIX:(j + 1) * N_PIX]           # (16, N)
            prod = q_cm * ku
            s = prod[0:NHB, :]
            for d in range(1, HEAD_DIM):                           # contract hd
                s = s + prod[d * NHB:(d + 1) * NHB, :]
            s_taps.append(s * DA_SCALE)                            # (NHB, N)
            v_taps.append(vu)

        # softmax over the K2 taps (all leading-axis / elementwise ops)
        s_max = functools.reduce(jnp.maximum, s_taps)
        e_taps = [jnp.exp(s - s_max) for s in s_taps]
        denom = functools.reduce(lambda a, b: a + b, e_taps)
        inv_den = pl.reciprocal(denom, approx=True)                # (NHB, N)

        # weighted sum of the unfolded v taps; replicate the (NHB, N) weights
        # across the head_dim sublane blocks (d-major layout => row r uses
        # weight row r % NHB) instead of 36 sub-8-row slices.
        acc = jnp.tile(e_taps[0] * inv_den, (HEAD_DIM, 1)) * v_taps[0]
        for j in range(1, K2):
            acc = acc + jnp.tile(e_taps[j] * inv_den, (HEAD_DIM, 1)) * v_taps[j]
        lae_blocks.append(acc)                                     # (DCH, N)

    # ---- GAE: global attention against 2x2 average-pooled keys/values ----
    xp_tok = jnp.dot(pool_ref[...], xm_tok,
                     preferred_element_type=jnp.float32)           # (M, C)
    xp_cm = jnp.dot(xm_cm, pool_t_ref[...],
                    preferred_element_type=jnp.float32)            # (C, M)
    k_tok = jnp.dot(xp_tok, w_lk_ref[...],
                    preferred_element_type=jnp.float32)            # (M, LDIM)
    v_cm = jnp.dot(w_lv_ref[...], xp_cm,
                   preferred_element_type=jnp.float32)             # (LDIM, M)

    lq_base = 6 * DCH
    gae_blocks = []
    for lh in range(LHEADS):
        q_h = pmain[lq_base + lh * HEAD_DIM:lq_base + (lh + 1) * HEAD_DIM, :]
        k_h = k_tok[:, lh * HEAD_DIM:(lh + 1) * HEAD_DIM]          # (M, hd)
        v_h = v_cm[lh * HEAD_DIM:(lh + 1) * HEAD_DIM, :]           # (hd, M)
        s = jnp.dot(k_h, q_h, preferred_element_type=jnp.float32) * GAE_SCALE
        s_max = jnp.max(s, axis=0, keepdims=True)                  # (1, N)
        e = jnp.exp(s - s_max)
        attn = e * pl.reciprocal(jnp.sum(e, axis=0, keepdims=True), approx=True)
        gae_blocks.append(jnp.dot(v_h, attn,
                                  preferred_element_type=jnp.float32))  # (hd, N)

    # ---- fused output projection: block-diag [proj | lproj] in ONE matmul --
    feats = jnp.concatenate(lae_blocks + gae_blocks, axis=0)       # (48, N)
    slab = jnp.dot(w_out_ref[...], feats,
                   preferred_element_type=jnp.float32) + b_out_ref[...]
    out_ref[0] = slab                                              # (48, N)


# ----------------------------- weight assembly ------------------------------
def _assemble_kernel_weights(params):
    w_qkv = params["w_qkv"]               # (C, 3C) canonical (in, out)
    blocks = []
    for i in range(NUM_DILATION):         # q blocks (d-major column order)
        base = i * DCH
        blocks.append(w_qkv[:, base:base + DCH][:, _BLOCKPERM])
    for i in range(NUM_DILATION):         # k_i then v_i, adjacent per dilation
        kbase = NUM_DILATION * DCH + i * DCH
        vbase = 2 * NUM_DILATION * DCH + i * DCH
        blocks.append(w_qkv[:, kbase:kbase + DCH][:, _BLOCKPERM])
        blocks.append(w_qkv[:, vbase:vbase + DCH][:, _BLOCKPERM])
    blocks.append(params["w_lq"])         # (C, LDIM) canonical head-major
    w_main = jnp.concatenate(blocks, axis=1).T          # (112, 32)

    # block-diagonal fused output projection: channel-major, LAE rows are in
    # the kernel-internal d-major order hence the row permutation.
    w_proj_cm = params["w_proj"][_PROJPERM, :].T        # (32, 32)
    w_lproj_cm = params["w_lproj"].T                    # (16, 16)
    w_out = jnp.zeros((DIM + LDIM, DIM + LDIM), jnp.float32)
    w_out = w_out.at[:DIM, :DIM].set(w_proj_cm)
    w_out = w_out.at[DIM:, DIM:].set(w_lproj_cm)
    b_out = jnp.concatenate([params["b_proj"], params["b_lproj"]]
                            ).reshape(DIM + LDIM, 1)

    w_lk = params["w_lkv"][:, :LDIM]                    # (32, 16)
    w_lv_cm = params["w_lkv"][:, LDIM:].T               # (16, 32)
    return w_main, w_out, b_out, w_lk, w_lv_cm


# --------------------------------- forward ----------------------------------
def esff_forward(x, params):
    b_in, h, w, c = x.shape                              # (28, 8, 8, 32)
    n = h * w
    x_tok = x.reshape(b_in, n, c).astype(jnp.float32)    # (28, N, C)
    x_cm = x_tok.transpose(0, 2, 1)                      # (28, C, N)

    w_main, w_out, b_out, w_lk, w_lv_cm = _assemble_kernel_weights(params)
    gather = jnp.asarray(_GATHER_NP)
    pool = jnp.asarray(_POOL_NP)
    pool_t = jnp.asarray(_POOL_NP.T)

    def full2(shape):
        return pl.BlockSpec(shape, lambda b: (0, 0))

    def full3(shape):
        return pl.BlockSpec(shape, lambda b: (0, 0, 0))

    feats = pl.pallas_call(
        _esff_kernel,
        out_shape=jax.ShapeDtypeStruct((B_OUT, DIM + LDIM, n), jnp.float32),
        grid=(B_OUT,),
        in_specs=[
            pl.BlockSpec((GROUP, c, n), lambda b: (b, 0, 0)),  # x channel-major
            pl.BlockSpec((GROUP, n, c), lambda b: (b, 0, 0)),  # x token-major
            full2((6 * DCH + LDIM, DIM)),                      # fused projection
            full2((DIM + LDIM, DIM + LDIM)),                   # block-diag out proj
            full2((DIM + LDIM, 1)),                            # fused out bias
            full2((DIM, LDIM)),                                # w_lk
            full2((LDIM, DIM)),                                # w_lv (cm)
            full3((NUM_DILATION, n, K2 * n)),                  # unfold gather
            full2((M_PIX, n)),                                 # avg-pool (tok)
            full2((n, M_PIX)),                                 # avg-pool (cm)
        ],
        out_specs=pl.BlockSpec((1, DIM + LDIM, n), lambda b: (b, 0, 0)),
        compiler_params=pltpu.CompilerParams(
            dimension_semantics=("parallel",)),
    )(x_cm, x_tok, w_main, w_out, b_out, w_lk, w_lv_cm, gather, pool, pool_t)

    # Classifier on the flattened (H, W, C_lae + C_gae) features.  This tiny
    # (4, 3072) x (3072, 2) matmul is left to XLA: a dedicated Pallas call
    # producing a (4, 2) output would be pure launch/masked-store overhead.
    flat = feats.transpose(0, 2, 1).reshape(B_OUT, n * (DIM + LDIM))
    return jnp.dot(flat, params["w_cls"]) + params["b_cls"]


# ----------------------------- parameter setup ------------------------------
def init_params(key):
    ks = jax.random.split(key, 6)
    std = 0.02
    return {
        "w_qkv":   jax.random.normal(ks[0], (DIM, 3 * DIM), jnp.float32) * std,
        "w_proj":  jax.random.normal(ks[1], (DIM, DIM), jnp.float32) * std,
        "b_proj":  jnp.zeros((DIM,), jnp.float32),
        "w_lq":    jax.random.normal(ks[2], (DIM, LDIM), jnp.float32) * std,
        "w_lkv":   jax.random.normal(ks[3], (DIM, 2 * LDIM), jnp.float32) * std,
        "w_lproj": jax.random.normal(ks[4], (LDIM, LDIM), jnp.float32) * std,
        "b_lproj": jnp.zeros((LDIM,), jnp.float32),
        "w_cls":   jax.random.normal(ks[5], (CLS_IN, 2), jnp.float32) * std,
        "b_cls":   jnp.zeros((2,), jnp.float32),
    }


# ----------------------------------- main ------------------------------------
if __name__ == "__main__":
    key = jax.random.PRNGKey(0)
    kx, kp = jax.random.split(key)
    x = jax.random.normal(kx, (B_IN, H, W, DIM), jnp.float32)
    params = init_params(kp)

    out = jax.jit(esff_forward)(x, params)
    out = jax.block_until_ready(out)

    assert out.shape == (B_OUT, 2), out.shape
    assert bool(jnp.all(jnp.isfinite(out)))
    print("KERNEL_OK")
</pallas_src>

<mosaic_0001>
module attributes {stable_mosaic.version = 11 : i64} {
  func.func @_esff_kernel(%arg0: i32, %arg1: memref<7x32x64xf32, #tpu.memory_space<vmem>>, %arg2: memref<7x64x32xf32, #tpu.memory_space<vmem>>, %arg3: memref<112x32xf32, #tpu.memory_space<vmem>>, %arg4: memref<48x48xf32, #tpu.memory_space<vmem>>, %arg5: memref<48x1xf32, #tpu.memory_space<vmem>>, %arg6: memref<32x16xf32, #tpu.memory_space<vmem>>, %arg7: memref<16x32xf32, #tpu.memory_space<vmem>>, %arg8: memref<2x64x576xf32, #tpu.memory_space<vmem>>, %arg9: memref<16x64xf32, #tpu.memory_space<vmem>>, %arg10: memref<64x16xf32, #tpu.memory_space<vmem>>, %arg11: memref<1x48x64xf32, #tpu.memory_space<vmem>>) attributes {dimension_semantics = [#tpu.dimension_semantics<parallel>], iteration_bounds = array<i64: 4>, scalar_prefetch = 0 : i64, scratch_operands = 0 : i64, tpu.core_type = #tpu.core_type<tc>, window_params = [{transform_indices = @transform_0, window_bounds = array<i64: 7, 32, 64>}, {transform_indices = @transform_1, window_bounds = array<i64: 7, 64, 32>}, {pipeline_mode = #tpu.pipeline_mode<synchronous>, transform_indices = @transform_2, window_bounds = array<i64: 112, 32>}, {pipeline_mode = #tpu.pipeline_mode<synchronous>, transform_indices = @transform_3, window_bounds = array<i64: 48, 48>}, {pipeline_mode = #tpu.pipeline_mode<synchronous>, transform_indices = @transform_4, window_bounds = array<i64: 48, 1>}, {pipeline_mode = #tpu.pipeline_mode<synchronous>, transform_indices = @transform_5, window_bounds = array<i64: 32, 16>}, {pipeline_mode = #tpu.pipeline_mode<synchronous>, transform_indices = @transform_6, window_bounds = array<i64: 16, 32>}, {pipeline_mode = #tpu.pipeline_mode<synchronous>, transform_indices = @transform_7, window_bounds = array<i64: 2, 64, 576>}, {pipeline_mode = #tpu.pipeline_mode<synchronous>, transform_indices = @transform_8, window_bounds = array<i64: 16, 64>}, {pipeline_mode = #tpu.pipeline_mode<synchronous>, transform_indices = @transform_9, window_bounds = array<i64: 64, 16>}, {transform_indices = @transform_10, window_bounds = array<i64: 1, 48, 64>}]} {
    %c0 = arith.constant 0 : index
    %c0_0 = arith.constant 0 : index
    %c0_1 = arith.constant 0 : index
    %0 = vector.load %arg1[%c0, %c0_0, %c0_1] : memref<7x32x64xf32, #tpu.memory_space<vmem>>, vector<1x32x64xf32>
    %1 = vector.shape_cast %0 : vector<1x32x64xf32> to vector<32x64xf32>
    %c0_2 = arith.constant 0 : index
    %c0_3 = arith.constant 0 : index
    %c0_4 = arith.constant 0 : index
    %2 = vector.load %arg2[%c0_2, %c0_3, %c0_4] : memref<7x64x32xf32, #tpu.memory_space<vmem>>, vector<1x64x32xf32>
    %3 = vector.shape_cast %2 : vector<1x64x32xf32> to vector<64x32xf32>
    %c1 = arith.constant 1 : index
    %c0_5 = arith.constant 0 : index
    %c0_6 = arith.constant 0 : index
    %4 = vector.load %arg1[%c1, %c0_5, %c0_6] : memref<7x32x64xf32, #tpu.memory_space<vmem>>, vector<1x32x64xf32>
    %5 = vector.shape_cast %4 : vector<1x32x64xf32> to vector<32x64xf32>
    %6 = arith.addf %1, %5 : vector<32x64xf32>
    %c1_7 = arith.constant 1 : index
    %c0_8 = arith.constant 0 : index
    %c0_9 = arith.constant 0 : index
    %7 = vector.load %arg2[%c1_7, %c0_8, %c0_9] : memref<7x64x32xf32, #tpu.memory_space<vmem>>, vector<1x64x32xf32>
    %8 = vector.shape_cast %7 : vector<1x64x32xf32> to vector<64x32xf32>
    %9 = arith.addf %3, %8 : vector<64x32xf32>
    %c2 = arith.constant 2 : index
    %c0_10 = arith.constant 0 : index
    %c0_11 = arith.constant 0 : index
    %10 = vector.load %arg1[%c2, %c0_10, %c0_11] : memref<7x32x64xf32, #tpu.memory_space<vmem>>, vector<1x32x64xf32>
    %11 = vector.shape_cast %10 : vector<1x32x64xf32> to vector<32x64xf32>
    %12 = arith.addf %6, %11 : vector<32x64xf32>
    %c2_12 = arith.constant 2 : index
    %c0_13 = arith.constant 0 : index
    %c0_14 = arith.constant 0 : index
    %13 = vector.load %arg2[%c2_12, %c0_13, %c0_14] : memref<7x64x32xf32, #tpu.memory_space<vmem>>, vector<1x64x32xf32>
    %14 = vector.shape_cast %13 : vector<1x64x32xf32> to vector<64x32xf32>
    %15 = arith.addf %9, %14 : vector<64x32xf32>
    %c3 = arith.constant 3 : index
    %c0_15 = arith.constant 0 : index
    %c0_16 = arith.constant 0 : index
    %16 = vector.load %arg1[%c3, %c0_15, %c0_16] : memref<7x32x64xf32, #tpu.memory_space<vmem>>, vector<1x32x64xf32>
    %17 = vector.shape_cast %16 : vector<1x32x64xf32> to vector<32x64xf32>
    %18 = arith.addf %12, %17 : vector<32x64xf32>
    %c3_17 = arith.constant 3 : index
    %c0_18 = arith.constant 0 : index
    %c0_19 = arith.constant 0 : index
    %19 = vector.load %arg2[%c3_17, %c0_18, %c0_19] : memref<7x64x32xf32, #tpu.memory_space<vmem>>, vector<1x64x32xf32>
    %20 = vector.shape_cast %19 : vector<1x64x32xf32> to vector<64x32xf32>
    %21 = arith.addf %15, %20 : vector<64x32xf32>
    %c4 = arith.constant 4 : index
    %c0_20 = arith.constant 0 : index
    %c0_21 = arith.constant 0 : index
    %22 = vector.load %arg1[%c4, %c0_20, %c0_21] : memref<7x32x64xf32, #tpu.memory_space<vmem>>, vector<1x32x64xf32>
    %23 = vector.shape_cast %22 : vector<1x32x64xf32> to vector<32x64xf32>
    %24 = arith.addf %18, %23 : vector<32x64xf32>
    %c4_22 = arith.constant 4 : index
    %c0_23 = arith.constant 0 : index
    %c0_24 = arith.constant 0 : index
    %25 = vector.load %arg2[%c4_22, %c0_23, %c0_24] : memref<7x64x32xf32, #tpu.memory_space<vmem>>, vector<1x64x32xf32>
    %26 = vector.shape_cast %25 : vector<1x64x32xf32> to vector<64x32xf32>
    %27 = arith.addf %21, %26 : vector<64x32xf32>
    %c5 = arith.constant 5 : index
    %c0_25 = arith.constant 0 : index
    %c0_26 = arith.constant 0 : index
    %28 = vector.load %arg1[%c5, %c0_25, %c0_26] : memref<7x32x64xf32, #tpu.memory_space<vmem>>, vector<1x32x64xf32>
    %29 = vector.shape_cast %28 : vector<1x32x64xf32> to vector<32x64xf32>
    %30 = arith.addf %24, %29 : vector<32x64xf32>
    %c5_27 = arith.constant 5 : index
    %c0_28 = arith.constant 0 : index
    %c0_29 = arith.constant 0 : index
    %31 = vector.load %arg2[%c5_27, %c0_28, %c0_29] : memref<7x64x32xf32, #tpu.memory_space<vmem>>, vector<1x64x32xf32>
    %32 = vector.shape_cast %31 : vector<1x64x32xf32> to vector<64x32xf32>
    %33 = arith.addf %27, %32 : vector<64x32xf32>
    %c6 = arith.constant 6 : index
    %c0_30 = arith.constant 0 : index
    %c0_31 = arith.constant 0 : index
    %34 = vector.load %arg1[%c6, %c0_30, %c0_31] : memref<7x32x64xf32, #tpu.memory_space<vmem>>, vector<1x32x64xf32>
    %35 = vector.shape_cast %34 : vector<1x32x64xf32> to vector<32x64xf32>
    %36 = arith.addf %30, %35 : vector<32x64xf32>
    %c6_32 = arith.constant 6 : index
    %c0_33 = arith.constant 0 : index
    %c0_34 = arith.constant 0 : index
    %37 = vector.load %arg2[%c6_32, %c0_33, %c0_34] : memref<7x64x32xf32, #tpu.memory_space<vmem>>, vector<1x64x32xf32>
    %38 = vector.shape_cast %37 : vector<1x64x32xf32> to vector<64x32xf32>
    %39 = arith.addf %33, %38 : vector<64x32xf32>
    %cst = arith.constant 0.142857149 : f32
    %40 = vector.broadcast %cst : f32 to vector<32x64xf32>
    %41 = arith.mulf %36, %40 : vector<32x64xf32>
    %cst_35 = arith.constant 0.142857149 : f32
    %42 = vector.broadcast %cst_35 : f32 to vector<64x32xf32>
    %43 = arith.mulf %39, %42 : vector<64x32xf32>
    %c0_36 = arith.constant 0 : index
    %c0_37 = arith.constant 0 : index
    %44 = vector.load %arg3[%c0_36, %c0_37] : memref<112x32xf32, #tpu.memory_space<vmem>>, vector<112x32xf32>
    %cst_38 = arith.constant dense<0.000000e+00> : vector<112x64xf32>
    %45 = tpu.matmul %44, %41, %cst_38 {dimension_numbers = #tpu.dot_dimension_numbers<[1], [0], [0], [1], [0, 0, 1, 1], [], []>} : vector<112x32xf32>, vector<32x64xf32>, vector<112x64xf32> -> vector<112x64xf32>
    %46 = vector.extract_strided_slice %45 {offsets = [0, 0], sizes = [16, 64], strides = [1, 1]} : vector<112x64xf32> to vector<16x64xf32>
    %47 = vector.extract_strided_slice %45 {offsets = [32, 0], sizes = [32, 64], strides = [1, 1]} : vector<112x64xf32> to vector<32x64xf32>
    %c0_39 = arith.constant 0 : index
    %c0_40 = arith.constant 0 : index
    %c0_41 = arith.constant 0 : index
    %48 = vector.load %arg8[%c0_39, %c0_40, %c0_41] : memref<2x64x576xf32, #tpu.memory_space<vmem>>, vector<1x64x576xf32>
    %49 = vector.shape_cast %48 : vector<1x64x576xf32> to vector<64x576xf32>
    %cst_42 = arith.constant dense<0.000000e+00> : vector<32x576xf32>
    %50 = tpu.matmul %47, %49, %cst_42 {dimension_numbers = #tpu.dot_dimension_numbers<[1], [0], [0], [1], [0, 0, 1, 1], [], []>} : vector<32x64xf32>, vector<64x576xf32>, vector<32x576xf32> -> vector<32x576xf32>
    %51 = vector.extract_strided_slice %50 {offsets = [0, 0], sizes = [16, 64], strides = [1, 1]} : vector<32x576xf32> to vector<16x64xf32>
    %52 = vector.extract_strided_slice %50 {offsets = [16, 0], sizes = [16, 64], strides = [1, 1]} : vector<32x576xf32> to vector<16x64xf32>
    %53 = arith.mulf %46, %51 : vector<16x64xf32>
    %54 = vector.extract_strided_slice %53 {offsets = [0, 0], sizes = [4, 64], strides = [1, 1]} : vector<16x64xf32> to vector<4x64xf32>
    %55 = vector.extract_strided_slice %53 {offsets = [4, 0], sizes = [4, 64], strides = [1, 1]} : vector<16x64xf32> to vector<4x64xf32>
    %56 = arith.addf %54, %55 : vector<4x64xf32>
    %57 = vector.extract_strided_slice %53 {offsets = [8, 0], sizes = [4, 64], strides = [1, 1]} : vector<16x64xf32> to vector<4x64xf32>
    %58 = arith.addf %56, %57 : vector<4x64xf32>
    %59 = vector.extract_strided_slice %53 {offsets = [12, 0], sizes = [4, 64], strides = [1, 1]} : vector<16x64xf32> to vector<4x64xf32>
    %60 = arith.addf %58, %59 : vector<4x64xf32>
    %cst_43 = arith.constant 5.000000e-01 : f32
    %61 = vector.broadcast %cst_43 : f32 to vector<4x64xf32>
    %62 = arith.mulf %60, %61 : vector<4x64xf32>
    %63 = vector.extract_strided_slice %50 {offsets = [0, 64], sizes = [16, 64], strides = [1, 1]} : vector<32x576xf32> to vector<16x64xf32>
    %64 = vector.extract_strided_slice %50 {offsets = [16, 64], sizes = [16, 64], strides = [1, 1]} : vector<32x576xf32> to vector<16x64xf32>
    %65 = arith.mulf %46, %63 : vector<16x64xf32>
    %66 = vector.extract_strided_slice %65 {offsets = [0, 0], sizes = [4, 64], strides = [1, 1]} : vector<16x64xf32> to vector<4x64xf32>
    %67 = vector.extract_strided_slice %65 {offsets = [4, 0], sizes = [4, 64], strides = [1, 1]} : vector<16x64xf32> to vector<4x64xf32>
    %68 = arith.addf %66, %67 : vector<4x64xf32>
    %69 = vector.extract_strided_slice %65 {offsets = [8, 0], sizes = [4, 64], strides = [1, 1]} : vector<16x64xf32> to vector<4x64xf32>
    %70 = arith.addf %68, %69 : vector<4x64xf32>
    %71 = vector.extract_strided_slice %65 {offsets = [12, 0], sizes = [4, 64], strides = [1, 1]} : vector<16x64xf32> to vector<4x64xf32>
    %72 = arith.addf %70, %71 : vector<4x64xf32>
    %cst_44 = arith.constant 5.000000e-01 : f32
    %73 = vector.broadcast %cst_44 : f32 to vector<4x64xf32>
    %74 = arith.mulf %72, %73 : vector<4x64xf32>
    %75 = vector.extract_strided_slice %50 {offsets = [0, 128], sizes = [16, 64], strides = [1, 1]} : vector<32x576xf32> to vector<16x64xf32>
    %76 = vector.extract_strided_slice %50 {offsets = [16, 128], sizes = [16, 64], strides = [1, 1]} : vector<32x576xf32> to vector<16x64xf32>
    %77 = arith.mulf %46, %75 : vector<16x64xf32>
    %78 = vector.extract_strided_slice %77 {offsets = [0, 0], sizes = [4, 64], strides = [1, 1]} : vector<16x64xf32> to vector<4x64xf32>
    %79 = vector.extract_strided_slice %77 {offsets = [4, 0], sizes = [4, 64], strides = [1, 1]} : vector<16x64xf32> to vector<4x64xf32>
    %80 = arith.addf %78, %79 : vector<4x64xf32>
    %81 = vector.extract_strided_slice %77 {offsets = [8, 0], sizes = [4, 64], strides = [1, 1]} : vector<16x64xf32> to vector<4x64xf32>
    %82 = arith.addf %80, %81 : vector<4x64xf32>
    %83 = vector.extract_strided_slice %77 {offsets = [12, 0], sizes = [4, 64], strides = [1, 1]} : vector<16x64xf32> to vector<4x64xf32>
    %84 = arith.addf %82, %83 : vector<4x64xf32>
    %cst_45 = arith.constant 5.000000e-01 : f32
    %85 = vector.broadcast %cst_45 : f32 to vector<4x64xf32>
    %86 = arith.mulf %84, %85 : vector<4x64xf32>
    %87 = vector.extract_strided_slice %50 {offsets = [0, 192], sizes = [16, 64], strides = [1, 1]} : vector<32x576xf32> to vector<16x64xf32>
    %88 = vector.extract_strided_slice %50 {offsets = [16, 192], sizes = [16, 64], strides = [1, 1]} : vector<32x576xf32> to vector<16x64xf32>
    %89 = arith.mulf %46, %87 : vector<16x64xf32>
    %90 = vector.extract_strided_slice %89 {offsets = [0, 0], sizes = [4, 64], strides = [1, 1]} : vector<16x64xf32> to vector<4x64xf32>
    %91 = vector.extract_strided_slice %89 {offsets = [4, 0], sizes = [4, 64], strides = [1, 1]} : vector<16x64xf32> to vector<4x64xf32>
    %92 = arith.addf %90, %91 : vector<4x64xf32>
    %93 = vector.extract_strided_slice %89 {offsets = [8, 0], sizes = [4, 64], strides = [1, 1]} : vector<16x64xf32> to vector<4x64xf32>
    %94 = arith.addf %92, %93 : vector<4x64xf32>
    %95 = vector.extract_strided_slice %89 {offsets = [12, 0], sizes = [4, 64], strides = [1, 1]} : vector<16x64xf32> to vector<4x64xf32>
    %96 = arith.addf %94, %95 : vector<4x64xf32>
    %cst_46 = arith.constant 5.000000e-01 : f32
    %97 = vector.broadcast %cst_46 : f32 to vector<4x64xf32>
    %98 = arith.mulf %96, %97 : vector<4x64xf32>
    %99 = vector.extract_strided_slice %50 {offsets = [0, 256], sizes = [16, 64], strides = [1, 1]} : vector<32x576xf32> to vector<16x64xf32>
    %100 = vector.extract_strided_slice %50 {offsets = [16, 256], sizes = [16, 64], strides = [1, 1]} : vector<32x576xf32> to vector<16x64xf32>
    %101 = arith.mulf %46, %99 : vector<16x64xf32>
    %102 = vector.extract_strided_slice %101 {offsets = [0, 0], sizes = [4, 64], strides = [1, 1]} : vector<16x64xf32> to vector<4x64xf32>
    %103 = vector.extract_strided_slice %101 {offsets = [4, 0], sizes = [4, 64], strides = [1, 1]} : vector<16x64xf32> to vector<4x64xf32>
    %104 = arith.addf %102, %103 : vector<4x64xf32>
    %105 = vector.extract_strided_slice %101 {offsets = [8, 0], sizes = [4, 64], strides = [1, 1]} : vector<16x64xf32> to vector<4x64xf32>
    %106 = arith.addf %104, %105 : vector<4x64xf32>
    %107 = vector.extract_strided_slice %101 {offsets = [12, 0], sizes = [4, 64], strides = [1, 1]} : vector<16x64xf32> to vector<4x64xf32>
    %108 = arith.addf %106, %107 : vector<4x64xf32>
    %cst_47 = arith.constant 5.000000e-01 : f32
    %109 = vector.broadcast %cst_47 : f32 to vector<4x64xf32>
    %110 = arith.mulf %108, %109 : vector<4x64xf32>
    %111 = vector.extract_strided_slice %50 {offsets = [0, 320], sizes = [16, 64], strides = [1, 1]} : vector<32x576xf32> to vector<16x64xf32>
    %112 = vector.extract_strided_slice %50 {offsets = [16, 320], sizes = [16, 64], strides = [1, 1]} : vector<32x576xf32> to vector<16x64xf32>
    %113 = arith.mulf %46, %111 : vector<16x64xf32>
    %114 = vector.extract_strided_slice %113 {offsets = [0, 0], sizes = [4, 64], strides = [1, 1]} : vector<16x64xf32> to vector<4x64xf32>
    %115 = vector.extract_strided_slice %113 {offsets = [4, 0], sizes = [4, 64], strides = [1, 1]} : vector<16x64xf32> to vector<4x64xf32>
    %116 = arith.addf %114, %115 : vector<4x64xf32>
    %117 = vector.extract_strided_slice %113 {offsets = [8, 0], sizes = [4, 64], strides = [1, 1]} : vector<16x64xf32> to vector<4x64xf32>
    %118 = arith.addf %116, %117 : vector<4x64xf32>
    %119 = vector.extract_strided_slice %113 {offsets = [12, 0], sizes = [4, 64], strides = [1, 1]} : vector<16x64xf32> to vector<4x64xf32>
    %120 = arith.addf %118, %119 : vector<4x64xf32>
    %cst_48 = arith.constant 5.000000e-01 : f32
    %121 = vector.broadcast %cst_48 : f32 to vector<4x64xf32>
    %122 = arith.mulf %120, %121 : vector<4x64xf32>
    %123 = vector.extract_strided_slice %50 {offsets = [0, 384], sizes = [16, 64], strides = [1, 1]} : vector<32x576xf32> to vector<16x64xf32>
    %124 = vector.extract_strided_slice %50 {offsets = [16, 384], sizes = [16, 64], strides = [1, 1]} : vector<32x576xf32> to vector<16x64xf32>
    %125 = arith.mulf %46, %123 : vector<16x64xf32>
    %126 = vector.extract_strided_slice %125 {offsets = [0, 0], sizes = [4, 64], strides = [1, 1]} : vector<16x64xf32> to vector<4x64xf32>
    %127 = vector.extract_strided_slice %125 {offsets = [4, 0], sizes = [4, 64], strides = [1, 1]} : vector<16x64xf32> to vector<4x64xf32>
    %128 = arith.addf %126, %127 : vector<4x64xf32>
    %129 = vector.extract_strided_slice %125 {offsets = [8, 0], sizes = [4, 64], strides = [1, 1]} : vector<16x64xf32> to vector<4x64xf32>
    %130 = arith.addf %128, %129 : vector<4x64xf32>
    %131 = vector.extract_strided_slice %125 {offsets = [12, 0], sizes = [4, 64], strides = [1, 1]} : vector<16x64xf32> to vector<4x64xf32>
    %132 = arith.addf %130, %131 : vector<4x64xf32>
    %cst_49 = arith.constant 5.000000e-01 : f32
    %133 = vector.broadcast %cst_49 : f32 to vector<4x64xf32>
    %134 = arith.mulf %132, %133 : vector<4x64xf32>
    %135 = vector.extract_strided_slice %50 {offsets = [0, 448], sizes = [16, 64], strides = [1, 1]} : vector<32x576xf32> to vector<16x64xf32>
    %136 = vector.extract_strided_slice %50 {offsets = [16, 448], sizes = [16, 64], strides = [1, 1]} : vector<32x576xf32> to vector<16x64xf32>
    %137 = arith.mulf %46, %135 : vector<16x64xf32>
    %138 = vector.extract_strided_slice %137 {offsets = [0, 0], sizes = [4, 64], strides = [1, 1]} : vector<16x64xf32> to vector<4x64xf32>
    %139 = vector.extract_strided_slice %137 {offsets = [4, 0], sizes = [4, 64], strides = [1, 1]} : vector<16x64xf32> to vector<4x64xf32>
    %140 = arith.addf %138, %139 : vector<4x64xf32>
    %141 = vector.extract_strided_slice %137 {offsets = [8, 0], sizes = [4, 64], strides = [1, 1]} : vector<16x64xf32> to vector<4x64xf32>
    %142 = arith.addf %140, %141 : vector<4x64xf32>
    %143 = vector.extract_strided_slice %137 {offsets = [12, 0], sizes = [4, 64], strides = [1, 1]} : vector<16x64xf32> to vector<4x64xf32>
    %144 = arith.addf %142, %143 : vector<4x64xf32>
    %cst_50 = arith.constant 5.000000e-01 : f32
    %145 = vector.broadcast %cst_50 : f32 to vector<4x64xf32>
    %146 = arith.mulf %144, %145 : vector<4x64xf32>
    %147 = vector.extract_strided_slice %50 {offsets = [0, 512], sizes = [16, 64], strides = [1, 1]} : vector<32x576xf32> to vector<16x64xf32>
    %148 = vector.extract_strided_slice %50 {offsets = [16, 512], sizes = [16, 64], strides = [1, 1]} : vector<32x576xf32> to vector<16x64xf32>
    %149 = arith.mulf %46, %147 : vector<16x64xf32>
    %150 = vector.extract_strided_slice %149 {offsets = [0, 0], sizes = [4, 64], strides = [1, 1]} : vector<16x64xf32> to vector<4x64xf32>
    %151 = vector.extract_strided_slice %149 {offsets = [4, 0], sizes = [4, 64], strides = [1, 1]} : vector<16x64xf32> to vector<4x64xf32>
    %152 = arith.addf %150, %151 : vector<4x64xf32>
    %153 = vector.extract_strided_slice %149 {offsets = [8, 0], sizes = [4, 64], strides = [1, 1]} : vector<16x64xf32> to vector<4x64xf32>
    %154 = arith.addf %152, %153 : vector<4x64xf32>
    %155 = vector.extract_strided_slice %149 {offsets = [12, 0], sizes = [4, 64], strides = [1, 1]} : vector<16x64xf32> to vector<4x64xf32>
    %156 = arith.addf %154, %155 : vector<4x64xf32>
    %cst_51 = arith.constant 5.000000e-01 : f32
    %157 = vector.broadcast %cst_51 : f32 to vector<4x64xf32>
    %158 = arith.mulf %156, %157 : vector<4x64xf32>
    %159 = arith.maximumf %62, %74 : vector<4x64xf32>
    %160 = arith.maximumf %159, %86 : vector<4x64xf32>
    %161 = arith.maximumf %160, %98 : vector<4x64xf32>
    %162 = arith.maximumf %161, %110 : vector<4x64xf32>
    %163 = arith.maximumf %162, %122 : vector<4x64xf32>
    %164 = arith.maximumf %163, %134 : vector<4x64xf32>
    %165 = arith.maximumf %164, %146 : vector<4x64xf32>
    %166 = arith.maximumf %165, %158 : vector<4x64xf32>
    %167 = arith.subf %62, %166 : vector<4x64xf32>
    %168 = math.exp %167 : vector<4x64xf32>
    %169 = arith.subf %74, %166 : vector<4x64xf32>
    %170 = math.exp %169 : vector<4x64xf32>
    %171 = arith.subf %86, %166 : vector<4x64xf32>
    %172 = math.exp %171 : vector<4x64xf32>
    %173 = arith.subf %98, %166 : vector<4x64xf32>
    %174 = math.exp %173 : vector<4x64xf32>
    %175 = arith.subf %110, %166 : vector<4x64xf32>
    %176 = math.exp %175 : vector<4x64xf32>
    %177 = arith.subf %122, %166 : vector<4x64xf32>
    %178 = math.exp %177 : vector<4x64xf32>
    %179 = arith.subf %134, %166 : vector<4x64xf32>
    %180 = math.exp %179 : vector<4x64xf32>
    %181 = arith.subf %146, %166 : vector<4x64xf32>
    %182 = math.exp %181 : vector<4x64xf32>
    %183 = arith.subf %158, %166 : vector<4x64xf32>
    %184 = math.exp %183 : vector<4x64xf32>
    %185 = arith.addf %168, %170 : vector<4x64xf32>
    %186 = arith.addf %185, %172 : vector<4x64xf32>
    %187 = arith.addf %186, %174 : vector<4x64xf32>
    %188 = arith.addf %187, %176 : vector<4x64xf32>
    %189 = arith.addf %188, %178 : vector<4x64xf32>
    %190 = arith.addf %189, %180 : vector<4x64xf32>
    %191 = arith.addf %190, %182 : vector<4x64xf32>
    %192 = arith.addf %191, %184 : vector<4x64xf32>
    %193 = tpu.reciprocal %192 {approx = true} : vector<4x64xf32> -> vector<4x64xf32>
    %194 = arith.mulf %168, %193 : vector<4x64xf32>
    %195 = tpu.concatenate %194, %194, %194, %194 in 0 : vector<4x64xf32>, vector<4x64xf32>, vector<4x64xf32>, vector<4x64xf32> -> vector<16x64xf32>
    %196 = arith.mulf %195, %52 : vector<16x64xf32>
    %197 = arith.mulf %170, %193 : vector<4x64xf32>
    %198 = tpu.concatenate %197, %197, %197, %197 in 0 : vector<4x64xf32>, vector<4x64xf32>, vector<4x64xf32>, vector<4x64xf32> -> vector<16x64xf32>
    %199 = arith.mulf %198, %64 : vector<16x64xf32>
    %200 = arith.addf %196, %199 : vector<16x64xf32>
    %201 = arith.mulf %172, %193 : vector<4x64xf32>
    %202 = tpu.concatenate %201, %201, %201, %201 in 0 : vector<4x64xf32>, vector<4x64xf32>, vector<4x64xf32>, vector<4x64xf32> -> vector<16x64xf32>
    %203 = arith.mulf %202, %76 : vector<16x64xf32>
    %204 = arith.addf %200, %203 : vector<16x64xf32>
    %205 = arith.mulf %174, %193 : vector<4x64xf32>
    %206 = tpu.concatenate %205, %205, %205, %205 in 0 : vector<4x64xf32>, vector<4x64xf32>, vector<4x64xf32>, vector<4x64xf32> -> vector<16x64xf32>
    %207 = arith.mulf %206, %88 : vector<16x64xf32>
    %208 = arith.addf %204, %207 : vector<16x64xf32>
    %209 = arith.mulf %176, %193 : vector<4x64xf32>
    %210 = tpu.concatenate %209, %209, %209, %209 in 0 : vector<4x64xf32>, vector<4x64xf32>, vector<4x64xf32>, vector<4x64xf32> -> vector<16x64xf32>
    %211 = arith.mulf %210, %100 : vector<16x64xf32>
    %212 = arith.addf %208, %211 : vector<16x64xf32>
    %213 = arith.mulf %178, %193 : vector<4x64xf32>
    %214 = tpu.concatenate %213, %213, %213, %213 in 0 : vector<4x64xf32>, vector<4x64xf32>, vector<4x64xf32>, vector<4x64xf32> -> vector<16x64xf32>
    %215 = arith.mulf %214, %112 : vector<16x64xf32>
    %216 = arith.addf %212, %215 : vector<16x64xf32>
    %217 = arith.mulf %180, %193 : vector<4x64xf32>
    %218 = tpu.concatenate %217, %217, %217, %217 in 0 : vector<4x64xf32>, vector<4x64xf32>, vector<4x64xf32>, vector<4x64xf32> -> vector<16x64xf32>
    %219 = arith.mulf %218, %124 : vector<16x64xf32>
    %220 = arith.addf %216, %219 : vector<16x64xf32>
    %221 = arith.mulf %182, %193 : vector<4x64xf32>
    %222 = tpu.concatenate %221, %221, %221, %221 in 0 : vector<4x64xf32>, vector<4x64xf32>, vector<4x64xf32>, vector<4x64xf32> -> vector<16x64xf32>
    %223 = arith.mulf %222, %136 : vector<16x64xf32>
    %224 = arith.addf %220, %223 : vector<16x64xf32>
    %225 = arith.mulf %184, %193 : vector<4x64xf32>
    %226 = tpu.concatenate %225, %225, %225, %225 in 0 : vector<4x64xf32>, vector<4x64xf32>, vector<4x64xf32>, vector<4x64xf32> -> vector<16x64xf32>
    %227 = arith.mulf %226, %148 : vector<16x64xf32>
    %228 = arith.addf %224, %227 : vector<16x64xf32>
    %229 = vector.extract_strided_slice %45 {offsets = [16, 0], sizes = [16, 64], strides = [1, 1]} : vector<112x64xf32> to vector<16x64xf32>
    %230 = vector.extract_strided_slice %45 {offsets = [64, 0], sizes = [32, 64], strides = [1, 1]} : vector<112x64xf32> to vector<32x64xf32>
    %c1_52 = arith.constant 1 : index
    %c0_53 = arith.constant 0 : index
    %c0_54 = arith.constant 0 : index
    %231 = vector.load %arg8[%c1_52, %c0_53, %c0_54] : memref<2x64x576xf32, #tpu.memory_space<vmem>>, vector<1x64x576xf32>
    %232 = vector.shape_cast %231 : vector<1x64x576xf32> to vector<64x576xf32>
    %cst_55 = arith.constant dense<0.000000e+00> : vector<32x576xf32>
    %233 = tpu.matmul %230, %232, %cst_55 {dimension_numbers = #tpu.dot_dimension_numbers<[1], [0], [0], [1], [0, 0, 1, 1], [], []>} : vector<32x64xf32>, vector<64x576xf32>, vector<32x576xf32> -> vector<32x576xf32>
    %234 = vector.extract_strided_slice %233 {offsets = [0, 0], sizes = [16, 64], strides = [1, 1]} : vector<32x576xf32> to vector<16x64xf32>
    %235 = vector.extract_strided_slice %233 {offsets = [16, 0], sizes = [16, 64], strides = [1, 1]} : vector<32x576xf32> to vector<16x64xf32>
    %236 = arith.mulf %229, %234 : vector<16x64xf32>
    %237 = vector.extract_strided_slice %236 {offsets = [0, 0], sizes = [4, 64], strides = [1, 1]} : vector<16x64xf32> to vector<4x64xf32>
    %238 = vector.extract_strided_slice %236 {offsets = [4, 0], sizes = [4, 64], strides = [1, 1]} : vector<16x64xf32> to vector<4x64xf32>
    %239 = arith.addf %237, %238 : vector<4x64xf32>
    %240 = vector.extract_strided_slice %236 {offsets = [8, 0], sizes = [4, 64], strides = [1, 1]} : vector<16x64xf32> to vector<4x64xf32>
    %241 = arith.addf %239, %240 : vector<4x64xf32>
    %242 = vector.extract_strided_slice %236 {offsets = [12, 0], sizes = [4, 64], strides = [1, 1]} : vector<16x64xf32> to vector<4x64xf32>
    %243 = arith.addf %241, %242 : vector<4x64xf32>
    %cst_56 = arith.constant 5.000000e-01 : f32
    %244 = vector.broadcast %cst_56 : f32 to vector<4x64xf32>
    %245 = arith.mulf %243, %244 : vector<4x64xf32>
    %246 = vector.extract_strided_slice %233 {offsets = [0, 64], sizes = [16, 64], strides = [1, 1]} : vector<32x576xf32> to vector<16x64xf32>
    %247 = vector.extract_strided_slice %233 {offsets = [16, 64], sizes = [16, 64], strides = [1, 1]} : vector<32x576xf32> to vector<16x64xf32>
    %248 = arith.mulf %229, %246 : vector<16x64xf32>
    %249 = vector.extract_strided_slice %248 {offsets = [0, 0], sizes = [4, 64], strides = [1, 1]} : vector<16x64xf32> to vector<4x64xf32>
    %250 = vector.extract_strided_slice %248 {offsets = [4, 0], sizes = [4, 64], strides = [1, 1]} : vector<16x64xf32> to vector<4x64xf32>
    %251 = arith.addf %249, %250 : vector<4x64xf32>
    %252 = vector.extract_strided_slice %248 {offsets = [8, 0], sizes = [4, 64], strides = [1, 1]} : vector<16x64xf32> to vector<4x64xf32>
    %253 = arith.addf %251, %252 : vector<4x64xf32>
    %254 = vector.extract_strided_slice %248 {offsets = [12, 0], sizes = [4, 64], strides = [1, 1]} : vector<16x64xf32> to vector<4x64xf32>
    %255 = arith.addf %253, %254 : vector<4x64xf32>
    %cst_57 = arith.constant 5.000000e-01 : f32
    %256 = vector.broadcast %cst_57 : f32 to vector<4x64xf32>
    %257 = arith.mulf %255, %256 : vector<4x64xf32>
    %258 = vector.extract_strided_slice %233 {offsets = [0, 128], sizes = [16, 64], strides = [1, 1]} : vector<32x576xf32> to vector<16x64xf32>
    %259 = vector.extract_strided_slice %233 {offsets = [16, 128], sizes = [16, 64], strides = [1, 1]} : vector<32x576xf32> to vector<16x64xf32>
    %260 = arith.mulf %229, %258 : vector<16x64xf32>
    %261 = vector.extract_strided_slice %260 {offsets = [0, 0], sizes = [4, 64], strides = [1, 1]} : vector<16x64xf32> to vector<4x64xf32>
    %262 = vector.extract_strided_slice %260 {offsets = [4, 0], sizes = [4, 64], strides = [1, 1]} : vector<16x64xf32> to vector<4x64xf32>
    %263 = arith.addf %261, %262 : vector<4x64xf32>
    %264 = vector.extract_strided_slice %260 {offsets = [8, 0], sizes = [4, 64], strides = [1, 1]} : vector<16x64xf32> to vector<4x64xf32>
    %265 = arith.addf %263, %264 : vector<4x64xf32>
    %266 = vector.extract_strided_slice %260 {offsets = [12, 0], sizes = [4, 64], strides = [1, 1]} : vector<16x64xf32> to vector<4x64xf32>
    %267 = arith.addf %265, %266 : vector<4x64xf32>
    %cst_58 = arith.constant 5.000000e-01 : f32
    %268 = vector.broadcast %cst_58 : f32 to vector<4x64xf32>
    %269 = arith.mulf %267, %268 : vector<4x64xf32>
    %270 = vector.extract_strided_slice %233 {offsets = [0, 192], sizes = [16, 64], strides = [1, 1]} : vector<32x576xf32> to vector<16x64xf32>
    %271 = vector.extract_strided_slice %233 {offsets = [16, 192], sizes = [16, 64], strides = [1, 1]} : vector<32x576xf32> to vector<16x64xf32>
    %272 = arith.mulf %229, %270 : vector<16x64xf32>
    %273 = vector.extract_strided_slice %272 {offsets = [0, 0], sizes = [4, 64], strides = [1, 1]} : vector<16x64xf32> to vector<4x64xf32>
    %274 = vector.extract_strided_slice %272 {offsets = [4, 0], sizes = [4, 64], strides = [1, 1]} : vector<16x64xf32> to vector<4x64xf32>
    %275 = arith.addf %273, %274 : vector<4x64xf32>
    %276 = vector.extract_strided_slice %272 {offsets = [8, 0], sizes = [4, 64], strides = [1, 1]} : vector<16x64xf32> to vector<4x64xf32>
    %277 = arith.addf %275, %276 : vector<4x64xf32>
    %278 = vector.extract_strided_slice %272 {offsets = [12, 0], sizes = [4, 64], strides = [1, 1]} : vector<16x64xf32> to vector<4x64xf32>
    %279 = arith.addf %277, %278 : vector<4x64xf32>
    %cst_59 = arith.constant 5.000000e-01 : f32
    %280 = vector.broadcast %cst_59 : f32 to vector<4x64xf32>
    %281 = arith.mulf %279, %280 : vector<4x64xf32>
    %282 = vector.extract_strided_slice %233 {offsets = [0, 256], sizes = [16, 64], strides = [1, 1]} : vector<32x576xf32> to vector<16x64xf32>
    %283 = vector.extract_strided_slice %233 {offsets = [16, 256], sizes = [16, 64], strides = [1, 1]} : vector<32x576xf32> to vector<16x64xf32>
    %284 = arith.mulf %229, %282 : vector<16x64xf32>
    %285 = vector.extract_strided_slice %284 {offsets = [0, 0], sizes = [4, 64], strides = [1, 1]} : vector<16x64xf32> to vector<4x64xf32>
    %286 = vector.extract_strided_slice %284 {offsets = [4, 0], sizes = [4, 64], strides = [1, 1]} : vector<16x64xf32> to vector<4x64xf32>
    %287 = arith.addf %285, %286 : vector<4x64xf32>
    %288 = vector.extract_strided_slice %284 {offsets = [8, 0], sizes = [4, 64], strides = [1, 1]} : vector<16x64xf32> to vector<4x64xf32>
    %289 = arith.addf %287, %288 : vector<4x64xf32>
    %290 = vector.extract_strided_slice %284 {offsets = [12, 0], sizes = [4, 64], strides = [1, 1]} : vector<16x64xf32> to vector<4x64xf32>
    %291 = arith.addf %289, %290 : vector<4x64xf32>
    %cst_60 = arith.constant 5.000000e-01 : f32
    %292 = vector.broadcast %cst_60 : f32 to vector<4x64xf32>
    %293 = arith.mulf %291, %292 : vector<4x64xf32>
    %294 = vector.extract_strided_slice %233 {offsets = [0, 320], sizes = [16, 64], strides = [1, 1]} : vector<32x576xf32> to vector<16x64xf32>
    %295 = vector.extract_strided_slice %233 {offsets = [16, 320], sizes = [16, 64], strides = [1, 1]} : vector<32x576xf32> to vector<16x64xf32>
    %296 = arith.mulf %229, %294 : vector<16x64xf32>
    %297 = vector.extract_strided_slice %296 {offsets = [0, 0], sizes = [4, 64], strides = [1, 1]} : vector<16x64xf32> to vector<4x64xf32>
    %298 = vector.extract_strided_slice %296 {offsets = [4, 0], sizes = [4, 64], strides = [1, 1]} : vector<16x64xf32> to vector<4x64xf32>
    %299 = arith.addf %297, %298 : vector<4x64xf32>
    %300 = vector.extract_strided_slice %296 {offsets = [8, 0], sizes = [4, 64], strides = [1, 1]} : vector<16x64xf32> to vector<4x64xf32>
    %301 = arith.addf %299, %300 : vector<4x64xf32>
    %302 = vector.extract_strided_slice %296 {offsets = [12, 0], sizes = [4, 64], strides = [1, 1]} : vector<16x64xf32> to vector<4x64xf32>
    %303 = arith.addf %301, %302 : vector<4x64xf32>
    %cst_61 = arith.constant 5.000000e-01 : f32
    %304 = vector.broadcast %cst_61 : f32 to vector<4x64xf32>
    %305 = arith.mulf %303, %304 : vector<4x64xf32>
    %306 = vector.extract_strided_slice %233 {offsets = [0, 384], sizes = [16, 64], strides = [1, 1]} : vector<32x576xf32> to vector<16x64xf32>
    %307 = vector.extract_strided_slice %233 {offsets = [16, 384], sizes = [16, 64], strides = [1, 1]} : vector<32x576xf32> to vector<16x64xf32>
    %308 = arith.mulf %229, %306 : vector<16x64xf32>
    %309 = vector.extract_strided_slice %308 {offsets = [0, 0], sizes = [4, 64], strides = [1, 1]} : vector<16x64xf32> to vector<4x64xf32>
    %310 = vector.extract_strided_slice %308 {offsets = [4, 0], sizes = [4, 64], strides = [1, 1]} : vector<16x64xf32> to vector<4x64xf32>
    %311 = arith.addf %309, %310 : vector<4x64xf32>
    %312 = vector.extract_strided_slice %308 {offsets = [8, 0], sizes = [4, 64], strides = [1, 1]} : vector<16x64xf32> to vector<4x64xf32>
    %313 = arith.addf %311, %312 : vector<4x64xf32>
    %314 = vector.extract_strided_slice %308 {offsets = [12, 0], sizes = [4, 64], strides = [1, 1]} : vector<16x64xf32> to vector<4x64xf32>
    %315 = arith.addf %313, %314 : vector<4x64xf32>
    %cst_62 = arith.constant 5.000000e-01 : f32
    %316 = vector.broadcast %cst_62 : f32 to vector<4x64xf32>
    %317 = arith.mulf %315, %316 : vector<4x64xf32>
    %318 = vector.extract_strided_slice %233 {offsets = [0, 448], sizes = [16, 64], strides = [1, 1]} : vector<32x576xf32> to vector<16x64xf32>
    %319 = vector.extract_strided_slice %233 {offsets = [16, 448], sizes = [16, 64], strides = [1, 1]} : vector<32x576xf32> to vector<16x64xf32>
    %320 = arith.mulf %229, %318 : vector<16x64xf32>
    %321 = vector.extract_strided_slice %320 {offsets = [0, 0], sizes = [4, 64], strides = [1, 1]} : vector<16x64xf32> to vector<4x64xf32>
    %322 = vector.extract_strided_slice %320 {offsets = [4, 0], sizes = [4, 64], strides = [1, 1]} : vector<16x64xf32> to vector<4x64xf32>
    %323 = arith.addf %321, %322 : vector<4x64xf32>
    %324 = vector.extract_strided_slice %320 {offsets = [8, 0], sizes = [4, 64], strides = [1, 1]} : vector<16x64xf32> to vector<4x64xf32>
    %325 = arith.addf %323, %324 : vector<4x64xf32>
    %326 = vector.extract_strided_slice %320 {offsets = [12, 0], sizes = [4, 64], strides = [1, 1]} : vector<16x64xf32> to vector<4x64xf32>
    %327 = arith.addf %325, %326 : vector<4x64xf32>
    %cst_63 = arith.constant 5.000000e-01 : f32
    %328 = vector.broadcast %cst_63 : f32 to vector<4x64xf32>
    %329 = arith.mulf %327, %328 : vector<4x64xf32>
    %330 = vector.extract_strided_slice %233 {offsets = [0, 512], sizes = [16, 64], strides = [1, 1]} : vector<32x576xf32> to vector<16x64xf32>
    %331 = vector.extract_strided_slice %233 {offsets = [16, 512], sizes = [16, 64], strides = [1, 1]} : vector<32x576xf32> to vector<16x64xf32>
    %332 = arith.mulf %229, %330 : vector<16x64xf32>
    %333 = vector.extract_strided_slice %332 {offsets = [0, 0], sizes = [4, 64], strides = [1, 1]} : vector<16x64xf32> to vector<4x64xf32>
    %334 = vector.extract_strided_slice %332 {offsets = [4, 0], sizes = [4, 64], strides = [1, 1]} : vector<16x64xf32> to vector<4x64xf32>
    %335 = arith.addf %333, %334 : vector<4x64xf32>
    %336 = vector.extract_strided_slice %332 {offsets = [8, 0], sizes = [4, 64], strides = [1, 1]} : vector<16x64xf32> to vector<4x64xf32>
    %337 = arith.addf %335, %336 : vector<4x64xf32>
    %338 = vector.extract_strided_slice %332 {offsets = [12, 0], sizes = [4, 64], strides = [1, 1]} : vector<16x64xf32> to vector<4x64xf32>
    %339 = arith.addf %337, %338 : vector<4x64xf32>
    %cst_64 = arith.constant 5.000000e-01 : f32
    %340 = vector.broadcast %cst_64 : f32 to vector<4x64xf32>
    %341 = arith.mulf %339, %340 : vector<4x64xf32>
    %342 = arith.maximumf %245, %257 : vector<4x64xf32>
    %343 = arith.maximumf %342, %269 : vector<4x64xf32>
    %344 = arith.maximumf %343, %281 : vector<4x64xf32>
    %345 = arith.maximumf %344, %293 : vector<4x64xf32>
    %346 = arith.maximumf %345, %305 : vector<4x64xf32>
    %347 = arith.maximumf %346, %317 : vector<4x64xf32>
    %348 = arith.maximumf %347, %329 : vector<4x64xf32>
    %349 = arith.maximumf %348, %341 : vector<4x64xf32>
    %350 = arith.subf %245, %349 : vector<4x64xf32>
    %351 = math.exp %350 : vector<4x64xf32>
    %352 = arith.subf %257, %349 : vector<4x64xf32>
    %353 = math.exp %352 : vector<4x64xf32>
    %354 = arith.subf %269, %349 : vector<4x64xf32>
    %355 = math.exp %354 : vector<4x64xf32>
    %356 = arith.subf %281, %349 : vector<4x64xf32>
    %357 = math.exp %356 : vector<4x64xf32>
    %358 = arith.subf %293, %349 : vector<4x64xf32>
    %359 = math.exp %358 : vector<4x64xf32>
    %360 = arith.subf %305, %349 : vector<4x64xf32>
    %361 = math.exp %360 : vector<4x64xf32>
    %362 = arith.subf %317, %349 : vector<4x64xf32>
    %363 = math.exp %362 : vector<4x64xf32>
    %364 = arith.subf %329, %349 : vector<4x64xf32>
    %365 = math.exp %364 : vector<4x64xf32>
    %366 = arith.subf %341, %349 : vector<4x64xf32>
    %367 = math.exp %366 : vector<4x64xf32>
    %368 = arith.addf %351, %353 : vector<4x64xf32>
    %369 = arith.addf %368, %355 : vector<4x64xf32>
    %370 = arith.addf %369, %357 : vector<4x64xf32>
    %371 = arith.addf %370, %359 : vector<4x64xf32>
    %372 = arith.addf %371, %361 : vector<4x64xf32>
    %373 = arith.addf %372, %363 : vector<4x64xf32>
    %374 = arith.addf %373, %365 : vector<4x64xf32>
    %375 = arith.addf %374, %367 : vector<4x64xf32>
    %376 = tpu.reciprocal %375 {approx = true} : vector<4x64xf32> -> vector<4x64xf32>
    %377 = arith.mulf %351, %376 : vector<4x64xf32>
    %378 = tpu.concatenate %377, %377, %377, %377 in 0 : vector<4x64xf32>, vector<4x64xf32>, vector<4x64xf32>, vector<4x64xf32> -> vector<16x64xf32>
    %379 = arith.mulf %378, %235 : vector<16x64xf32>
    %380 = arith.mulf %353, %376 : vector<4x64xf32>
    %381 = tpu.concatenate %380, %380, %380, %380 in 0 : vector<4x64xf32>, vector<4x64xf32>, vector<4x64xf32>, vector<4x64xf32> -> vector<16x64xf32>
    %382 = arith.mulf %381, %247 : vector<16x64xf32>
    %383 = arith.addf %379, %382 : vector<16x64xf32>
    %384 = arith.mulf %355, %376 : vector<4x64xf32>
    %385 = tpu.concatenate %384, %384, %384, %384 in 0 : vector<4x64xf32>, vector<4x64xf32>, vector<4x64xf32>, vector<4x64xf32> -> vector<16x64xf32>
    %386 = arith.mulf %385, %259 : vector<16x64xf32>
    %387 = arith.addf %383, %386 : vector<16x64xf32>
    %388 = arith.mulf %357, %376 : vector<4x64xf32>
    %389 = tpu.concatenate %388, %388, %388, %388 in 0 : vector<4x64xf32>, vector<4x64xf32>, vector<4x64xf32>, vector<4x64xf32> -> vector<16x64xf32>
    %390 = arith.mulf %389, %271 : vector<16x64xf32>
    %391 = arith.addf %387, %390 : vector<16x64xf32>
    %392 = arith.mulf %359, %376 : vector<4x64xf32>
    %393 = tpu.concatenate %392, %392, %392, %392 in 0 : vector<4x64xf32>, vector<4x64xf32>, vector<4x64xf32>, vector<4x64xf32> -> vector<16x64xf32>
    %394 = arith.mulf %393, %283 : vector<16x64xf32>
    %395 = arith.addf %391, %394 : vector<16x64xf32>
    %396 = arith.mulf %361, %376 : vector<4x64xf32>
    %397 = tpu.concatenate %396, %396, %396, %396 in 0 : vector<4x64xf32>, vector<4x64xf32>, vector<4x64xf32>, vector<4x64xf32> -> vector<16x64xf32>
    %398 = arith.mulf %397, %295 : vector<16x64xf32>
    %399 = arith.addf %395, %398 : vector<16x64xf32>
    %400 = arith.mulf %363, %376 : vector<4x64xf32>
    %401 = tpu.concatenate %400, %400, %400, %400 in 0 : vector<4x64xf32>, vector<4x64xf32>, vector<4x64xf32>, vector<4x64xf32> -> vector<16x64xf32>
    %402 = arith.mulf %401, %307 : vector<16x64xf32>
    %403 = arith.addf %399, %402 : vector<16x64xf32>
    %404 = arith.mulf %365, %376 : vector<4x64xf32>
    %405 = tpu.concatenate %404, %404, %404, %404 in 0 : vector<4x64xf32>, vector<4x64xf32>, vector<4x64xf32>, vector<4x64xf32> -> vector<16x64xf32>
    %406 = arith.mulf %405, %319 : vector<16x64xf32>
    %407 = arith.addf %403, %406 : vector<16x64xf32>
    %408 = arith.mulf %367, %376 : vector<4x64xf32>
    %409 = tpu.concatenate %408, %408, %408, %408 in 0 : vector<4x64xf32>, vector<4x64xf32>, vector<4x64xf32>, vector<4x64xf32> -> vector<16x64xf32>
    %410 = arith.mulf %409, %331 : vector<16x64xf32>
    %411 = arith.addf %407, %410 : vector<16x64xf32>
    %c0_65 = arith.constant 0 : index
    %c0_66 = arith.constant 0 : index
    %412 = vector.load %arg9[%c0_65, %c0_66] : memref<16x64xf32, #tpu.memory_space<vmem>>, vector<16x64xf32>
    %cst_67 = arith.constant dense<0.000000e+00> : vector<16x32xf32>
    %413 = tpu.matmul %412, %43, %cst_67 {dimension_numbers = #tpu.dot_dimension_numbers<[1], [0], [0], [1], [0, 0, 1, 1], [], []>} : vector<16x64xf32>, vector<64x32xf32>, vector<16x32xf32> -> vector<16x32xf32>
    %c0_68 = arith.constant 0 : index
    %c0_69 = arith.constant 0 : index
    %414 = vector.load %arg10[%c0_68, %c0_69] : memref<64x16xf32, #tpu.memory_space<vmem>>, vector<64x16xf32>
    %cst_70 = arith.constant dense<0.000000e+00> : vector<32x16xf32>
    %415 = tpu.matmul %41, %414, %cst_70 {dimension_numbers = #tpu.dot_dimension_numbers<[1], [0], [0], [1], [0, 0, 1, 1], [], []>} : vector<32x64xf32>, vector<64x16xf32>, vector<32x16xf32> -> vector<32x16xf32>
    %c0_71 = arith.constant 0 : index
    %c0_72 = arith.constant 0 : index
    %416 = vector.load %arg6[%c0_71, %c0_72] : memref<32x16xf32, #tpu.memory_space<vmem>>, vector<32x16xf32>
    %cst_73 = arith.constant dense<0.000000e+00> : vector<16x16xf32>
    %417 = tpu.matmul %413, %416, %cst_73 {dimension_numbers = #tpu.dot_dimension_numbers<[1], [0], [0], [1], [0, 0, 1, 1], [], []>} : vector<16x32xf32>, vector<32x16xf32>, vector<16x16xf32> -> vector<16x16xf32>
    %c0_74 = arith.constant 0 : index
    %c0_75 = arith.constant 0 : index
    %418 = vector.load %arg7[%c0_74, %c0_75] : memref<16x32xf32, #tpu.memory_space<vmem>>, vector<16x32xf32>
    %cst_76 = arith.constant dense<0.000000e+00> : vector<16x16xf32>
    %419 = tpu.matmul %418, %415, %cst_76 {dimension_numbers = #tpu.dot_dimension_numbers<[1], [0], [0], [1], [0, 0, 1, 1], [], []>} : vector<16x32xf32>, vector<32x16xf32>, vector<16x16xf32> -> vector<16x16xf32>
    %420 = vector.extract_strided_slice %45 {offsets = [96, 0], sizes = [4, 64], strides = [1, 1]} : vector<112x64xf32> to vector<4x64xf32>
    %421 = vector.extract_strided_slice %417 {offsets = [0, 0], sizes = [16, 4], strides = [1, 1]} : vector<16x16xf32> to vector<16x4xf32>
    %422 = vector.extract_strided_slice %419 {offsets = [0, 0], sizes = [4, 16], strides = [1, 1]} : vector<16x16xf32> to vector<4x16xf32>
    %cst_77 = arith.constant dense<0.000000e+00> : vector<16x64xf32>
    %423 = tpu.matmul %421, %420, %cst_77 {dimension_numbers = #tpu.dot_dimension_numbers<[1], [0], [0], [1], [0, 0, 1, 1], [], []>} : vector<16x4xf32>, vector<4x64xf32>, vector<16x64xf32> -> vector<16x64xf32>
    %cst_78 = arith.constant 5.000000e-01 : f32
    %424 = vector.broadcast %cst_78 : f32 to vector<16x64xf32>
    %425 = arith.mulf %423, %424 : vector<16x64xf32>
    %cst_79 = arith.constant dense<0xFF800000> : vector<64xf32>
    %426 = vector.multi_reduction <maximumf>, %425, %cst_79 [0] : vector<16x64xf32> to vector<64xf32>
    %427 = vector.shape_cast %426 : vector<64xf32> to vector<1x64xf32>
    %428 = vector.broadcast %427 : vector<1x64xf32> to vector<16x64xf32>
    %429 = arith.subf %425, %428 : vector<16x64xf32>
    %430 = math.exp %429 : vector<16x64xf32>
    %cst_80 = arith.constant dense<0.000000e+00> : vector<64xf32>
    %431 = vector.multi_reduction <add>, %430, %cst_80 [0] : vector<16x64xf32> to vector<64xf32>
    %432 = vector.shape_cast %431 : vector<64xf32> to vector<1x64xf32>
    %433 = tpu.reciprocal %432 {approx = true} : vector<1x64xf32> -> vector<1x64xf32>
    %434 = vector.broadcast %433 : vector<1x64xf32> to vector<16x64xf32>
    %435 = arith.mulf %430, %434 : vector<16x64xf32>
    %cst_81 = arith.constant dense<0.000000e+00> : vector<4x64xf32>
    %436 = tpu.matmul %422, %435, %cst_81 {dimension_numbers = #tpu.dot_dimension_numbers<[1], [0], [0], [1], [0, 0, 1, 1], [], []>} : vector<4x16xf32>, vector<16x64xf32>, vector<4x64xf32> -> vector<4x64xf32>
    %437 = vector.extract_strided_slice %45 {offsets = [100, 0], sizes = [4, 64], strides = [1, 1]} : vector<112x64xf32> to vector<4x64xf32>
    %438 = vector.extract_strided_slice %417 {offsets = [0, 4], sizes = [16, 4], strides = [1, 1]} : vector<16x16xf32> to vector<16x4xf32>
    %439 = vector.extract_strided_slice %419 {offsets = [4, 0], sizes = [4, 16], strides = [1, 1]} : vector<16x16xf32> to vector<4x16xf32>
    %cst_82 = arith.constant dense<0.000000e+00> : vector<16x64xf32>
    %440 = tpu.matmul %438, %437, %cst_82 {dimension_numbers = #tpu.dot_dimension_numbers<[1], [0], [0], [1], [0, 0, 1, 1], [], []>} : vector<16x4xf32>, vector<4x64xf32>, vector<16x64xf32> -> vector<16x64xf32>
    %cst_83 = arith.constant 5.000000e-01 : f32
    %441 = vector.broadcast %cst_83 : f32 to vector<16x64xf32>
    %442 = arith.mulf %440, %441 : vector<16x64xf32>
    %cst_84 = arith.constant dense<0xFF800000> : vector<64xf32>
    %443 = vector.multi_reduction <maximumf>, %442, %cst_84 [0] : vector<16x64xf32> to vector<64xf32>
    %444 = vector.shape_cast %443 : vector<64xf32> to vector<1x64xf32>
    %445 = vector.broadcast %444 : vector<1x64xf32> to vector<16x64xf32>
    %446 = arith.subf %442, %445 : vector<16x64xf32>
    %447 = math.exp %446 : vector<16x64xf32>
    %cst_85 = arith.constant dense<0.000000e+00> : vector<64xf32>
    %448 = vector.multi_reduction <add>, %447, %cst_85 [0] : vector<16x64xf32> to vector<64xf32>
    %449 = vector.shape_cast %448 : vector<64xf32> to vector<1x64xf32>
    %450 = tpu.reciprocal %449 {approx = true} : vector<1x64xf32> -> vector<1x64xf32>
    %451 = vector.broadcast %450 : vector<1x64xf32> to vector<16x64xf32>
    %452 = arith.mulf %447, %451 : vector<16x64xf32>
    %cst_86 = arith.constant dense<0.000000e+00> : vector<4x64xf32>
    %453 = tpu.matmul %439, %452, %cst_86 {dimension_numbers = #tpu.dot_dimension_numbers<[1], [0], [0], [1], [0, 0, 1, 1], [], []>} : vector<4x16xf32>, vector<16x64xf32>, vector<4x64xf32> -> vector<4x64xf32>
    %454 = vector.extract_strided_slice %45 {offsets = [104, 0], sizes = [4, 64], strides = [1, 1]} : vector<112x64xf32> to vector<4x64xf32>
    %455 = vector.extract_strided_slice %417 {offsets = [0, 8], sizes = [16, 4], strides = [1, 1]} : vector<16x16xf32> to vector<16x4xf32>
    %456 = vector.extract_strided_slice %419 {offsets = [8, 0], sizes = [4, 16], strides = [1, 1]} : vector<16x16xf32> to vector<4x16xf32>
    %cst_87 = arith.constant dense<0.000000e+00> : vector<16x64xf32>
    %457 = tpu.matmul %455, %454, %cst_87 {dimension_numbers = #tpu.dot_dimension_numbers<[1], [0], [0], [1], [0, 0, 1, 1], [], []>} : vector<16x4xf32>, vector<4x64xf32>, vector<16x64xf32> -> vector<16x64xf32>
    %cst_88 = arith.constant 5.000000e-01 : f32
    %458 = vector.broadcast %cst_88 : f32 to vector<16x64xf32>
    %459 = arith.mulf %457, %458 : vector<16x64xf32>
    %cst_89 = arith.constant dense<0xFF800000> : vector<64xf32>
    %460 = vector.multi_reduction <maximumf>, %459, %cst_89 [0] : vector<16x64xf32> to vector<64xf32>
    %461 = vector.shape_cast %460 : vector<64xf32> to vector<1x64xf32>
    %462 = vector.broadcast %461 : vector<1x64xf32> to vector<16x64xf32>
    %463 = arith.subf %459, %462 : vector<16x64xf32>
    %464 = math.exp %463 : vector<16x64xf32>
    %cst_90 = arith.constant dense<0.000000e+00> : vector<64xf32>
    %465 = vector.multi_reduction <add>, %464, %cst_90 [0] : vector<16x64xf32> to vector<64xf32>
    %466 = vector.shape_cast %465 : vector<64xf32> to vector<1x64xf32>
    %467 = tpu.reciprocal %466 {approx = true} : vector<1x64xf32> -> vector<1x64xf32>
    %468 = vector.broadcast %467 : vector<1x64xf32> to vector<16x64xf32>
    %469 = arith.mulf %464, %468 : vector<16x64xf32>
    %cst_91 = arith.constant dense<0.000000e+00> : vector<4x64xf32>
    %470 = tpu.matmul %456, %469, %cst_91 {dimension_numbers = #tpu.dot_dimension_numbers<[1], [0], [0], [1], [0, 0, 1, 1], [], []>} : vector<4x16xf32>, vector<16x64xf32>, vector<4x64xf32> -> vector<4x64xf32>
    %471 = vector.extract_strided_slice %45 {offsets = [108, 0], sizes = [4, 64], strides = [1, 1]} : vector<112x64xf32> to vector<4x64xf32>
    %472 = vector.extract_strided_slice %417 {offsets = [0, 12], sizes = [16, 4], strides = [1, 1]} : vector<16x16xf32> to vector<16x4xf32>
    %473 = vector.extract_strided_slice %419 {offsets = [12, 0], sizes = [4, 16], strides = [1, 1]} : vector<16x16xf32> to vector<4x16xf32>
    %cst_92 = arith.constant dense<0.000000e+00> : vector<16x64xf32>
    %474 = tpu.matmul %472, %471, %cst_92 {dimension_numbers = #tpu.dot_dimension_numbers<[1], [0], [0], [1], [0, 0, 1, 1], [], []>} : vector<16x4xf32>, vector<4x64xf32>, vector<16x64xf32> -> vector<16x64xf32>
    %cst_93 = arith.constant 5.000000e-01 : f32
    %475 = vector.broadcast %cst_93 : f32 to vector<16x64xf32>
    %476 = arith.mulf %474, %475 : vector<16x64xf32>
    %cst_94 = arith.constant dense<0xFF800000> : vector<64xf32>
    %477 = vector.multi_reduction <maximumf>, %476, %cst_94 [0] : vector<16x64xf32> to vector<64xf32>
    %478 = vector.shape_cast %477 : vector<64xf32> to vector<1x64xf32>
    %479 = vector.broadcast %478 : vector<1x64xf32> to vector<16x64xf32>
    %480 = arith.subf %476, %479 : vector<16x64xf32>
    %481 = math.exp %480 : vector<16x64xf32>
    %cst_95 = arith.constant dense<0.000000e+00> : vector<64xf32>
    %482 = vector.multi_reduction <add>, %481, %cst_95 [0] : vector<16x64xf32> to vector<64xf32>
    %483 = vector.shape_cast %482 : vector<64xf32> to vector<1x64xf32>
    %484 = tpu.reciprocal %483 {approx = true} : vector<1x64xf32> -> vector<1x64xf32>
    %485 = vector.broadcast %484 : vector<1x64xf32> to vector<16x64xf32>
    %486 = arith.mulf %481, %485 : vector<16x64xf32>
    %cst_96 = arith.constant dense<0.000000e+00> : vector<4x64xf32>
    %487 = tpu.matmul %473, %486, %cst_96 {dimension_numbers = #tpu.dot_dimension_numbers<[1], [0], [0], [1], [0, 0, 1, 1], [], []>} : vector<4x16xf32>, vector<16x64xf32>, vector<4x64xf32> -> vector<4x64xf32>
    %488 = tpu.concatenate %228, %411, %436, %453, %470, %487 in 0 : vector<16x64xf32>, vector<16x64xf32>, vector<4x64xf32>, vector<4x64xf32>, vector<4x64xf32>, vector<4x64xf32> -> vector<48x64xf32>
    %c0_97 = arith.constant 0 : index
    %c0_98 = arith.constant 0 : index
    %489 = vector.load %arg4[%c0_97, %c0_98] : memref<48x48xf32, #tpu.memory_space<vmem>>, vector<48x48xf32>
    %cst_99 = arith.constant dense<0.000000e+00> : vector<48x64xf32>
    %490 = tpu.matmul %489, %488, %cst_99 {dimension_numbers = #tpu.dot_dimension_numbers<[1], [0], [0], [1], [0, 0, 1, 1], [], []>} : vector<48x48xf32>, vector<48x64xf32>, vector<48x64xf32> -> vector<48x64xf32>
    %c0_100 = arith.constant 0 : index
    %c0_101 = arith.constant 0 : index
    %491 = vector.load %arg5[%c0_100, %c0_101] : memref<48x1xf32, #tpu.memory_space<vmem>>, vector<48x1xf32>
    %492 = vector.broadcast %491 : vector<48x1xf32> to vector<48x64xf32>
    %493 = arith.addf %490, %492 : vector<48x64xf32>
    %c0_102 = arith.constant 0 : index
    %c0_103 = arith.constant 0 : index
    %c0_104 = arith.constant 0 : index
    %494 = vector.load %arg11[%c0_102, %c0_103, %c0_104] : memref<1x48x64xf32, #tpu.memory_space<vmem>>, vector<1x48x64xf32>
    %495 = vector.shape_cast %494 : vector<1x48x64xf32> to vector<48x64xf32>
    %496 = vector.shape_cast %493 : vector<48x64xf32> to vector<1x48x64xf32>
    tpu.vector_store %arg11[%c0_102, %c0_103, %c0_104], %496 {strides = array<i32>} : memref<1x48x64xf32, #tpu.memory_space<vmem>>, vector<1x48x64xf32>,
    return
  }
  func.func @transform_0(%arg0: i32) -> (i32, i32, i32) {
    %c0_i32 = arith.constant 0 : i32
    %c0_i32_0 = arith.constant 0 : i32
    %c0_i32_1 = arith.constant 0 : i32
    return %arg0, %c0_i32, %c0_i32_0 : i32, i32, i32
  }
  func.func @transform_1(%arg0: i32) -> (i32, i32, i32) {
    %c0_i32 = arith.constant 0 : i32
    %c0_i32_0 = arith.constant 0 : i32
    %c0_i32_1 = arith.constant 0 : i32
    return %arg0, %c0_i32, %c0_i32_0 : i32, i32, i32
  }
  func.func @transform_2(%arg0: i32) -> (i32, i32) {
    %c0_i32 = arith.constant 0 : i32
    %c0_i32_0 = arith.constant 0 : i32
    %c0_i32_1 = arith.constant 0 : i32
    return %c0_i32, %c0_i32_0 : i32, i32
  }
  func.func @transform_3(%arg0: i32) -> (i32, i32) {
    %c0_i32 = arith.constant 0 : i32
    %c0_i32_0 = arith.constant 0 : i32
    %c0_i32_1 = arith.constant 0 : i32
    return %c0_i32, %c0_i32_0 : i32, i32
  }
  func.func @transform_4(%arg0: i32) -> (i32, i32) {
    %c0_i32 = arith.constant 0 : i32
    %c0_i32_0 = arith.constant 0 : i32
    %c0_i32_1 = arith.constant 0 : i32
    return %c0_i32, %c0_i32_0 : i32, i32
  }
  func.func @transform_5(%arg0: i32) -> (i32, i32) {
    %c0_i32 = arith.constant 0 : i32
    %c0_i32_0 = arith.constant 0 : i32
    %c0_i32_1 = arith.constant 0 : i32
    return %c0_i32, %c0_i32_0 : i32, i32
  }
  func.func @transform_6(%arg0: i32) -> (i32, i32) {
    %c0_i32 = arith.constant 0 : i32
    %c0_i32_0 = arith.constant 0 : i32
    %c0_i32_1 = arith.constant 0 : i32
    return %c0_i32, %c0_i32_0 : i32, i32
  }
  func.func @transform_7(%arg0: i32) -> (i32, i32, i32) {
    %c0_i32 = arith.constant 0 : i32
    %c0_i32_0 = arith.constant 0 : i32
    %c0_i32_1 = arith.constant 0 : i32
    %c0_i32_2 = arith.constant 0 : i32
    return %c0_i32, %c0_i32_0, %c0_i32_1 : i32, i32, i32
  }
  func.func @transform_8(%arg0: i32) -> (i32, i32) {
    %c0_i32 = arith.constant 0 : i32
    %c0_i32_0 = arith.constant 0 : i32
    %c0_i32_1 = arith.constant 0 : i32
    return %c0_i32, %c0_i32_0 : i32, i32
  }
  func.func @transform_9(%arg0: i32) -> (i32, i32) {
    %c0_i32 = arith.constant 0 : i32
    %c0_i32_0 = arith.constant 0 : i32
    %c0_i32_1 = arith.constant 0 : i32
    return %c0_i32, %c0_i32_0 : i32, i32
  }
  func.func @transform_10(%arg0: i32) -> (i32, i32, i32) {
    %c0_i32 = arith.constant 0 : i32
    %c0_i32_0 = arith.constant 0 : i32
    %c0_i32_1 = arith.constant 0 : i32
    return %arg0, %c0_i32, %c0_i32_0 : i32, i32, i32
  }
}

</mosaic_0001>

<bundles_post_ra>
// kernel: esff_forward.1
= control target key start
LH: loop header
LB: loop body
LE: loop exit
PB: predicated region body
PF: predicated region fallthrough
CT: control target
= control target key end

     0   :  { %s2711_s13 = smov 0   ;;  %s3830_s0 = inlined_call_operand.vmem [shape: f32[28,32,64], index: 0, kind: input, shape index: {}]   ;;  %s3831_s1 = inlined_call_operand.vmem [shape: f32[28,64,32], index: 1, kind: input, shape index: {}]   ;;  %s3832_s2 = inlined_call_operand.vmem [shape: f32[112,32], index: 2, kind: input, shape index: {}]   ;;  %s3833_s3 = inlined_call_operand.vmem [shape: f32[48,48], index: 3, kind: input, shape index: {}]   ;;  %s3834_s4 = inlined_call_operand.vmem [shape: f32[48,1], index: 4, kind: input, shape index: {}]   ;;  %s3835_s5 = inlined_call_operand.vmem [shape: f32[32,16], index: 5, kind: input, shape index: {}]   ;;  %s3836_s6 = inlined_call_operand.vmem [shape: f32[16,32], index: 6, kind: input, shape index: {}]   ;;  %s3837_s7 = inlined_call_operand.vmem [shape: f32[2,64,576], index: 7, kind: input, shape index: {}]   ;;  %s3838_s8 = inlined_call_operand.vmem [shape: f32[16,64], index: 8, kind: input, shape index: {}]   ;;  %s3839_s9 = inlined_call_operand.vmem [shape: f32[64,16], index: 9, kind: input, shape index: {}]   ;;  %s3840_s10 = inlined_call_operand.vmem [shape: f32[4,48,64], index: 10, kind: output, shape index: {}]  }
   0x1 LB: > { %s2717_s14 = sadd.s32 4294967295, %s2649_s13   ;;  %p2342_p0 = scmp.ge.s32.totalorder %s2649_s13, 1  ;;  %s2649_s13 = sphi %s2711_s13, %s20_s13  }
   0x2   : > { %p326_p1 = scmp.lt.s32.totalorder %s2649_s13, 5 }
   0x4   : > { %p327_p2 = pnand %p2342_p0, %p326_p1 }
   0x6   : > { %330 = sbr.rel (%p327_p2) target bundleno = 1358 (0x54e), region = 60 }
   0xb   : > { %s371_s15 = smul.u32 7, %s2717_s14  ;;  %v570_v56 = vld [vmem:[%s3832_s2] sm:$0xff]  ;;  %vm584_vm0 = vcmask 261120   ;;  %v571_v57 = vld [vmem:[%s3832_s2 + $0x8] sm:$0xff]  ;;  %v572_v58 = vld [vmem:[%s3832_s2 + $0x10] sm:$0xff]  ;;  %vm726_vm1 = vcmask 523264  }
   0xc   : > { %v573_v59 = vld [vmem:[%s3832_s2 + $0x18] sm:$0xff]  ;;  %v574_v60 = vld [vmem:[%s3832_s2 + $0x20] sm:$0xff]  ;;  %v575_v61 = vld [vmem:[%s3832_s2 + $0x28] sm:$0xff]  ;;  %vm1072_vm2 = vcmask 1043456   ;;  %vm1817_vm3 = vcmask 31744   ;;  %s2651_s11 = smov 120  }
   0xd   : > { %p372_p3 = scmp.lt.s32.totalorder %s371_s15, 27  ;;  %v576_v62 = vld [vmem:[%s3832_s2 + $0x30] sm:$0xff]  ;;  %v577_v63 = vld [vmem:[%s3832_s2 + $0x38] sm:$0xff]  ;;  %s2652_s12 = smov 124   ;;  %vm1879_vm4 = vcmask 130048   ;;  %vm2211_vm5 = vcmask 392192  }
   0xe   : > { %s2654_s17 = smov 64   ;;  %p385_p4 = scmp.lt.s32.totalorder %s2717_s14, 3 }
   0xf   : > { %s3866_s15 = smov (!%p372_p3, %s371_s15), 27 }
  0x10   : > { %s2548_s16 = sshll.u32 %s3866_s15, 5  ;;  %s2549_s21 = sshll.u32 %s3866_s15, 6 }
  0x11   : > { %s2728_s19 = scalar_lea.vmem %s3830_s0, %s2548_s16  ;;  %s2980_s24 = scalar_lea.vmem %s3831_s1, %s2549_s21 }
  0x12   : > { %v393_v0 = vld [vmem:[%s2728_s19 + $0x18] sm:$0xff]  ;;  %v392_v5 = vld [vmem:[%s2728_s19 + $0x10] sm:$0xff]  ;;  %v391_v12 = vld [vmem:[%s2728_s19 + $0x8] sm:$0xff]  ;;  %s2653_s16 = smov 116   ;;  %s3868_s14 = smov (!%p385_p4, %s2717_s14), 3 }
  0x13   : > { %v2351_v1 = vld [vmem:[%s2728_s19 + $0x38] sm:$0xff]  ;;  %v2350_v6 = vld [vmem:[%s2728_s19 + $0x30] sm:$0xff]  ;;  %v2349_v15 = vld [vmem:[%s2728_s19 + $0x28] sm:$0xff]  ;;  %s2562_s28 = smul.u32 48, %s3868_s14 }
  0x14   : > { %v2363_v2 = vld [vmem:[%s2728_s19 + $0x58] sm:$0xff]  ;;  %v410_v3 = vadd.f32 %v2351_v1, %v393_v0  ;;  %v409_v8 = vadd.f32 %v2350_v6, %v392_v5  ;;  %v2362_v9 = vld [vmem:[%s2728_s19 + $0x50] sm:$0xff]  ;;  %v2361_v16 = vld [vmem:[%s2728_s19 + $0x48] sm:$0xff]  ;;  %v408_v19 = vadd.f32 %v2349_v15, %v391_v12 }
  0x15   : > { %v2375_v4 = vld [vmem:[%s2728_s19 + $0x78] sm:$0xff]  ;;  %v2374_v11 = vld [vmem:[%s2728_s19 + $0x70] sm:$0xff]  ;;  %v2373_v20 = vld [vmem:[%s2728_s19 + $0x68] sm:$0xff]  ;;  %s389_s30 = scalar_lea.vmem %s3840_s10, %s2562_s28 }
  0x16   : > { %v436_v7 = vadd.f32 %v2363_v2, %v410_v3  ;;  %v2387_v10 = vld [vmem:[%s2728_s19 + $0x98] sm:$0xff]  ;;  %v435_v14 = vadd.f32 %v2362_v9, %v409_v8  ;;  %v2386_v18 = vld [vmem:[%s2728_s19 + $0x90] sm:$0xff]  ;;  %v390_v23 = vld [vmem:[%s2728_s19] sm:$0xff]  ;;  %v434_v28 = vadd.f32 %v2361_v16, %v408_v19 }
  0x17   : > { %v2399_v17 = vld [vmem:[%s2728_s19 + $0xb8] sm:$0xff]  ;;  %v2348_v24 = vld [vmem:[%s2728_s19 + $0x20] sm:$0xff]  ;;  %v2398_v27 = vld [vmem:[%s2728_s19 + $0xb0] sm:$0xff] }
  0x18   : > { %v462_v13 = vadd.f32 %v2375_v4, %v436_v7  ;;  %v461_v22 = vadd.f32 %v2374_v11, %v435_v14  ;;  %v2360_v25 = vld [vmem:[%s2728_s19 + $0x40] sm:$0xff]  ;;  %v2411_v26 = vld [vmem:[%s2728_s19 + $0xd8] sm:$0xff]  ;;  %v407_v29 = vadd.f32 %v2348_v24, %v390_v23  ;;  %v2385_v32 = vld [vmem:[%s2728_s19 + $0x88] sm:$0xff]  ;;  %v460_v35 = vadd.f32 %v2373_v20, %v434_v28 }
  0x19   : > { %v2372_v33 = vld [vmem:[%s2728_s19 + $0x60] sm:$0xff]  ;;  %v2410_v34 = vld [vmem:[%s2728_s19 + $0xd0] sm:$0xff]  ;;  %v2397_v39 = vld [vmem:[%s2728_s19 + $0xa8] sm:$0xff] }
  0x1a   : > { %v488_v21 = vadd.f32 %v2387_v10, %v462_v13  ;;  %v487_v31 = vadd.f32 %v2386_v18, %v461_v22  ;;  %v433_v36 = vadd.f32 %v2360_v25, %v407_v29  ;;  %v2384_v40 = vld [vmem:[%s2728_s19 + $0x80] sm:$0xff]  ;;  %v486_v41 = vadd.f32 %v2385_v32, %v460_v35  ;;  %v2409_v45 = vld [vmem:[%s2728_s19 + $0xc8] sm:$0xff]  ;;  %v580_v2 = vld [vmem:[%s3832_s2 + $0x50] sm:$0xff] }
  0x1b   : > { %v2396_v46 = vld [vmem:[%s2728_s19 + $0xa0] sm:$0xff]  ;;  %v579_v1 = vld [vmem:[%s3832_s2 + $0x48] sm:$0xff]  ;;  %v581_v3 = vld [vmem:[%s3832_s2 + $0x58] sm:$0xff] }
  0x1c   : > { %v514_v30 = vadd.f32 %v2399_v17, %v488_v21  ;;  %v513_v38 = vadd.f32 %v2398_v27, %v487_v31  ;;  %v459_v42 = vadd.f32 %v2372_v33, %v433_v36  ;;  %v512_v47 = vadd.f32 %v2397_v39, %v486_v41  ;;  %v2408_v50 = vld [vmem:[%s2728_s19 + $0xc0] sm:$0xff]  ;;  %v721_v5 = vld [vmem:[%s3837_s7 + $0x118] sm:$0xff]  ;;  %v723_v7 = vld [vmem:[%s3837_s7 + $0x128] sm:$0xff] }
  0x1d   : > { %v578_v0 = vld [vmem:[%s3832_s2 + $0x40] sm:$0xff]  ;;  %747 = vmatpush.msra.mxu1 %v721_v5  ;;  %v725_v8 = vld [vmem:[%s3837_s7 + $0x138] sm:$0xff]  ;;  %v716_v9 = vld [vmem:[%s3837_s7 + $0xf0] sm:$0xff]  ;;  %805 = vmatpush.msra.mxu3 %v723_v7 }
  0x1e   : > { %v540_v37 = vadd.f32 %v2411_v26, %v514_v30  ;;  %v539_v44 = vadd.f32 %v2410_v34, %v513_v38  ;;  %v485_v48 = vadd.f32 %v2384_v40, %v459_v42  ;;  %v538_v51 = vadd.f32 %v2409_v45, %v512_v47  ;;  %v582_v4 = vld [vmem:[%s3832_s2 + $0x60] sm:$0xff]  ;;  %v717_v10 = vld [vmem:[%s3837_s7 + $0xf8] sm:$0xff]  ;;  %v720_v12 = vld [vmem:[%s3837_s7 + $0x110] sm:$0xff]  ;;  %863 = vmatpush.msra.mxu2 %v725_v8 }
  0x1f   : > { %v2827_v6 = vld [vmem:[%s3837_s7 + $0x120] sm:$0xff]  ;;  %748 = vmatpush.msra.mxu1 %v716_v9  ;;  %v711_v13 = vld [vmem:[%s3837_s7 + $0xc8] sm:$0xff]  ;;  %v712_v14 = vld [vmem:[%s3837_s7 + $0xd0] sm:$0xff] }
  0x20   : > { %v2755_v43 = vmul.f32 0.14285715, %v540_v37  ;;  %v2760_v49 = vmul.f32 0.14285715, %v539_v44  ;;  %v511_v52 = vadd.f32 %v2396_v46, %v485_v48  ;;  %v2764_v53 = vmul.f32 0.14285715, %v538_v51  ;;  %864 = vmatpush.msra.mxu2 %v720_v12 }
  0x21   : > { %v718_v11 = vld [vmem:[%s3837_s7 + $0x100] sm:$0xff]  ;;  %v713_v15 = vld [vmem:[%s3837_s7 + $0xd8] sm:$0xff]  ;;  %v715_v16 = vld [vmem:[%s3837_s7 + $0xe8] sm:$0xff]  ;;  %749 = vmatpush.msra.mxu1 %v711_v13 }
  0x22   : > { %639 = vmatpush.msra.mxu0 %v2755_v43  ;;  %v537_v54 = vadd.f32 %v2408_v50, %v511_v52  ;;  %806 = vmatpush.msra.mxu3 %v718_v11  ;;  %v706_v17 = vld [vmem:[%s3837_s7 + $0xa0] sm:$0xff]  ;;  %v707_v18 = vld [vmem:[%s3837_s7 + $0xa8] sm:$0xff]  ;;  %v708_v19 = vld [vmem:[%s3837_s7 + $0xb0] sm:$0xff] }
  0x23   : > { %865 = vmatpush.msra.mxu2 %v715_v16  ;;  %750 = vmatpush.msra.mxu1 %v706_v17  ;;  %v710_v20 = vld [vmem:[%s3837_s7 + $0xc0] sm:$0xff]  ;;  %v583_v21 = vld [vmem:[%s3832_s2 + $0x68] sm:$0xff]  ;;  %v701_v22 = vld [vmem:[%s3837_s7 + $0x78] sm:$0xff] }
  0x24   : > { %640 = vmatpush.msra.mxu0 %v2760_v49  ;;  %v2767_v55 = vmul.f32 0.14285715, %v537_v54  ;;  %807 = vmatpush.msra.mxu3 %v713_v15  ;;  %v702_v23 = vld [vmem:[%s3837_s7 + $0x80] sm:$0xff]  ;;  %v703_v24 = vld [vmem:[%s3837_s7 + $0x88] sm:$0xff]  ;;  %v705_v25 = vld [vmem:[%s3837_s7 + $0x98] sm:$0xff] }
  0x25   : > { %866 = vmatpush.msra.mxu2 %v710_v20  ;;  %751 = vmatpush.msra.mxu1 %v701_v22  ;;  %v696_v26 = vld [vmem:[%s3837_s7 + $0x50] sm:$0xff]  ;;  %v697_v27 = vld [vmem:[%s3837_s7 + $0x58] sm:$0xff]  ;;  %v698_v28 = vld [vmem:[%s3837_s7 + $0x60] sm:$0xff] }
  0x26   : > { %641 = vmatpush.msra.mxu0 %v2764_v53  ;;  %808 = vmatpush.msra.mxu3 %v708_v19  ;;  %v700_v29 = vld [vmem:[%s3837_s7 + $0x70] sm:$0xff]  ;;  %v691_v30 = vld [vmem:[%s3837_s7 + $0x28] sm:$0xff]  ;;  %v693_v32 = vld [vmem:[%s3837_s7 + $0x38] sm:$0xff] }
  0x27   : > { %867 = vmatpush.msra.mxu2 %v705_v25  ;;  %752 = vmatpush.msra.mxu1 %v696_v26  ;;  %v692_v31 = vld [vmem:[%s3837_s7 + $0x30] sm:$0xff]  ;;  %v695_v33 = vld [vmem:[%s3837_s7 + $0x48] sm:$0xff]  ;;  %v686_v34 = vld [vmem:[%s3837_s7] sm:$0xff] }
  0x28   : > { %642 = vmatpush.msra.mxu0 %v2767_v55  ;;  %809 = vmatpush.msra.mxu3 %v703_v24  ;;  %v687_v35 = vld [vmem:[%s3837_s7 + $0x8] sm:$0xff]  ;;  %v688_v36 = vld [vmem:[%s3837_s7 + $0x10] sm:$0xff]  ;;  %v690_v38 = vld [vmem:[%s3837_s7 + $0x20] sm:$0xff] }
  0x29   : > { %2420 = vmatmul.msk.f32.vlgmr.msra.gmra.mxu0 %vm584_vm0, %v570_v56  ;;  %868 = vmatpush.msra.mxu2 %v700_v29  ;;  %v2491_v39 = vld [vmem:[%s3837_s7 + $0x268] sm:$0xff]  ;;  %v2486_v41 = vld [vmem:[%s3837_s7 + $0x240] sm:$0xff]  ;;  %v2481_v42 = vld [vmem:[%s3837_s7 + $0x218] sm:$0xff] }
  0x2a   : > { %776 = vmatpush.msrb.mxu0 %v2827_v6  ;;  %810 = vmatpush.msra.mxu3 %v698_v28  ;;  %v2489_v45 = vld [vmem:[%s3837_s7 + $0x258] sm:$0xff]  ;;  %v2476_v46 = vld [vmem:[%s3837_s7 + $0x1f0] sm:$0xff]  ;;  %v2471_v48 = vld [vmem:[%s3837_s7 + $0x1c8] sm:$0xff] }
  0x2b   : > { %753 = vmatpush.msra.mxu1 %v691_v30  ;;  %869 = vmatpush.msra.mxu2 %v695_v33  ;;  %v2484_v47 = vld [vmem:[%s3837_s7 + $0x230] sm:$0xff]  ;;  %v2479_v50 = vld [vmem:[%s3837_s7 + $0x208] sm:$0xff]  ;;  %v2474_v52 = vld [vmem:[%s3837_s7 + $0x1e0] sm:$0xff] }
  0x2c   : > { %777 = vmatpush.msrb.mxu0 %v717_v10  ;;  %811 = vmatpush.msra.mxu3 %v693_v32  ;;  %v2469_v54 = vld [vmem:[%s3837_s7 + $0x1b8] sm:$0xff]  ;;  %v2466_v56 = vld [vmem:[%s3837_s7 + $0x1a0] sm:$0xff]  ;;  %v400_v8 = vld [vmem:[%s2980_s24 + $0x30] sm:$0xff] }
  0x2d   : > { %754 = vmatpush.msra.mxu1 %v686_v34  ;;  %870 = vmatpush.msra.mxu2 %v690_v38  ;;  %v714_v5 = vld [vmem:[%s3837_s7 + $0xe0] sm:$0xff]  ;;  %v2358_v9 = vld [vmem:[%s2980_s24 + $0x70] sm:$0xff]  ;;  %v399_v16 = vld [vmem:[%s2980_s24 + $0x28] sm:$0xff] }
  0x2e   : > { %778 = vmatpush.msrb.mxu0 %v712_v14  ;;  %812 = vmatpush.msra.mxu3 %v688_v36  ;;  %v426_v11 = vadd.f32 %v2358_v9, %v400_v8  ;;  %v2370_v15 = vld [vmem:[%s2980_s24 + $0xb0] sm:$0xff]  ;;  %v2407_v17 = vld [vmem:[%s2980_s24 + $0x178] sm:$0xff]  ;;  %v2357_v19 = vld [vmem:[%s2980_s24 + $0x68] sm:$0xff] }
  0x2f   : > { %2550 = vmatpush.msrb.mxu1 %v2827_v6  ;;  %1299 = vmatpush.msrb.mxu2 %v2491_v39  ;;  %v2383_v6 = vld [vmem:[%s2980_s24 + $0xf8] sm:$0xff]  ;;  %v2382_v22 = vld [vmem:[%s2980_s24 + $0xf0] sm:$0xff]  ;;  %v425_v24 = vadd.f32 %v2357_v19, %v399_v16  ;;  %v699_v29 = vld [vmem:[%s3837_s7 + $0x68] sm:$0xff] }
  0x30   : > { %779 = vmatpush.msrb.mxu0 %v707_v18  ;;  %1241 = vmatpush.msrb.mxu3 %v2489_v45  ;;  %v2419_v25 = vld [vmem:[%s2980_s24 + $0x1b8] sm:$0xff]  ;;  %v2369_v30 = vld [vmem:[%s2980_s24 + $0xa8] sm:$0xff]  ;;  %v2418_v33 = vld [vmem:[%s2980_s24 + $0x1b0] sm:$0xff] }
  0x31   : > { %2421 = vmatmul.msk.f32.gmra.mxu0 %vm584_vm0, %v571_v57  ;;  %2551 = vmatpush.msrb.mxu1 %v717_v10  ;;  %v2464_v57 = vld [vmem:[%s3837_s7 + $0x190] sm:$0xff]  ;;  %v2395_v10 = vld [vmem:[%s2980_s24 + $0x138] sm:$0xff]  ;;  %v451_v34 = vadd.f32 %v2369_v30, %v425_v24  ;;  %v694_v38 = vld [vmem:[%s3837_s7 + $0x40] sm:$0xff] }
  0x32   : > { %780 = vmatpush.msrb.mxu0 %v702_v23  ;;  %1300 = vmatpush.msrb.mxu2 %v2486_v41  ;;  %v398_v39 = vld [vmem:[%s2980_s24 + $0x20] sm:$0xff]  ;;  %v2366_v19 = vld [vmem:[%s2980_s24 + $0x90] sm:$0xff] }
  0x33   : > { %2552 = vmatpush.msrb.mxu1 %v712_v14  ;;  %1242 = vmatpush.msrb.mxu3 %v2484_v47  ;;  %v709_v14 = vld [vmem:[%s3837_s7 + $0xb8] sm:$0xff]  ;;  %v2356_v41 = vld [vmem:[%s2980_s24 + $0x60] sm:$0xff]  ;;  %v2405_v47 = vld [vmem:[%s2980_s24 + $0x168] sm:$0xff] }
  0x34   : > { %781 = vmatpush.msrb.mxu0 %v697_v27  ;;  %1301 = vmatpush.msrb.mxu2 %v2481_v42  ;;  %v2368_v42 = vld [vmem:[%s2980_s24 + $0xa0] sm:$0xff]  ;;  %v2378_v24 = vld [vmem:[%s2980_s24 + $0xd0] sm:$0xff] }
  0x35   : > { %2553 = vmatpush.msrb.mxu1 %v707_v18  ;;  %1243 = vmatpush.msrb.mxu3 %v2479_v50  ;;  %v452_v18 = vadd.f32 %v2370_v15, %v426_v11  ;;  %v397_v50 = vld [vmem:[%s2980_s24 + $0x18] sm:$0xff]  ;;  %v2416_v16 = vld [vmem:[%s2980_s24 + $0x1a0] sm:$0xff] }
  0x36   : > { %782 = vmatpush.msrb.mxu0 %v692_v31  ;;  %1302 = vmatpush.msrb.mxu2 %v2476_v46  ;;  %v2391_v15 = vld [vmem:[%s2980_s24 + $0x118] sm:$0xff] }
  0x37   : > { %2554 = vmatpush.msrb.mxu1 %v702_v23  ;;  %1244 = vmatpush.msrb.mxu3 %v2474_v52  ;;  %v2394_v23 = vld [vmem:[%s2980_s24 + $0x130] sm:$0xff]  ;;  %v478_v26 = vadd.f32 %v2382_v22, %v452_v18  ;;  %v2355_v52 = vld [vmem:[%s2980_s24 + $0x58] sm:$0xff] }
  0x38   : > { %783 = vmatpush.msrb.mxu0 %v687_v35  ;;  %1303 = vmatpush.msrb.mxu2 %v2471_v48  ;;  %v424_v48 = vadd.f32 %v2356_v41, %v398_v39  ;;  %v2403_v22 = vld [vmem:[%s2980_s24 + $0x158] sm:$0xff]  ;;  %v2402_v41 = vld [vmem:[%s2980_s24 + $0x150] sm:$0xff] }
  0x39   : > { %2422 = vmatmul.msk.f32.gmra.mxu0 %vm584_vm0, %v572_v58  ;;  %2555 = vmatpush.msrb.mxu1 %v697_v27  ;;  %v2461_v58 = vld [vmem:[%s3837_s7 + $0x178] sm:$0xff]  ;;  %v2406_v27 = vld [vmem:[%s2980_s24 + $0x170] sm:$0xff]  ;;  %v504_v32 = vadd.f32 %v2394_v23, %v478_v26 }
  0x3a   : > { %1245 = vmatpush.msrb.mxu3 %v2469_v54  ;;  %1304 = vmatpush.msrb.mxu2 %v2466_v56  ;;  %v2477_v39 = vld [vmem:[%s3837_s7 + $0x1f8] sm:$0xff] }
  0x3b   : > { %2556 = vmatpush.msrb.mxu1 %v692_v31  ;;  %v2381_v31 = vld [vmem:[%s2980_s24 + $0xe8] sm:$0xff]  ;;  %v530_v45 = vadd.f32 %v2406_v27, %v504_v32  ;;  %v2390_v27 = vld [vmem:[%s2980_s24 + $0x110] sm:$0xff]  ;;  %v2415_v32 = vld [vmem:[%s2980_s24 + $0x198] sm:$0xff] }
  0x3c   : > { %1246 = vmatpush.msrb.mxu3 %v2464_v57  ;;  %1305 = vmatpush.msrb.mxu2 %v2461_v58  ;;  %v477_v46 = vadd.f32 %v2381_v31, %v451_v34  ;;  %v2417_v57 = vld [vmem:[%s2980_s24 + $0x1a8] sm:$0xff]  ;;  %v2380_v58 = vld [vmem:[%s2980_s24 + $0xe0] sm:$0xff] }
  0x3d   : > { %2557 = vmatpush.msrb.mxu1 %v687_v35  ;;  %v2393_v35 = vld [vmem:[%s2980_s24 + $0x128] sm:$0xff] }
  0x41   : > { %2423 = vmatmul.msk.f32.gmra.mxu0 %vm584_vm0, %v573_v59  ;;  %v2459_v59 = vld [vmem:[%s3837_s7 + $0x168] sm:$0xff] }
  0x42   : > { %1247 = vmatpush.msrb.mxu3 %v2459_v59  ;;  %v423_v59 = vadd.f32 %v2355_v52, %v397_v50  ;;  %v2364_v50 = vld [vmem:[%s2980_s24 + $0x80] sm:$0xff] }
  0x49   : > { %2424 = vmatmul.msk.f32.gmra.mxu0 %vm584_vm0, %v574_v60 }
  0x51   : > { %2425 = vmatmul.msk.f32.gmra.mxu0 %vm584_vm0, %v575_v61  ;;  %v2454_v61 = vld [vmem:[%s3837_s7 + $0x140] sm:$0xff] }
  0x52   : > { %1248 = vmatpush.msrb.mxu3 %v2454_v61  ;;  %v2367_v61 = vld [vmem:[%s2980_s24 + $0x98] sm:$0xff] }
  0x59   : > { %2426 = vmatmul.msk.f32.gmra.mxu0 %vm584_vm0, %v576_v62  ;;  %v2456_v62 = vld [vmem:[%s3837_s7 + $0x150] sm:$0xff] }
  0x5a   : > { %1306 = vmatpush.msrb.mxu2 %v2456_v62  ;;  %v556_v62 = vadd.f32 %v2418_v33, %v530_v45 }
  0x5c   : > { %v568_v9 = vmul.f32 0.14285715, %v556_v62 }
  0x61   : > { %2427 = vmatmul.msk.f32.gmra.mxu0 %vm584_vm0, %v577_v63  ;;  %v724_v63 = vld [vmem:[%s3837_s7 + $0x130] sm:$0xff] }
  0x69   : > { %2428 = vmatmul.msk.f32.gmra.mxu0 %vm584_vm0, %v578_v0  ;;  %v719_v0 = vld [vmem:[%s3837_s7 + $0x108] sm:$0xff] }
  0x71   : > { %2429 = vmatmul.msk.f32.gmra.mxu0 %vm584_vm0, %v579_v1  ;;  %v401_v1 = vld [vmem:[%s2980_s24 + $0x38] sm:$0xff] }
  0x79   : > { %2430 = vmatmul.msk.f32.gmra.mxu0 %vm584_vm0, %v580_v2  ;;  %v2359_v2 = vld [vmem:[%s2980_s24 + $0x78] sm:$0xff] }
  0x81   : > { %2431 = vmatmul.msk.f32.gmra.mxu0 %vm584_vm0, %v581_v3  ;;  %v2371_v3 = vld [vmem:[%s2980_s24 + $0xb8] sm:$0xff] }
  0x89   : > { %2432 = vmatmul.msk.f32.gmra.mxu0 %vm584_vm0, %v582_v4  ;;  %v427_v4 = vadd.f32 %v2359_v2, %v401_v1  ;;  %v2379_v1 = vld [vmem:[%s2980_s24 + $0xd8] sm:$0xff]  ;;  %v396_v2 = vld [vmem:[%s2980_s24 + $0x10] sm:$0xff] }
  0x8b   : > { %v453_v7 = vadd.f32 %v2371_v3, %v427_v4  ;;  %v2354_v3 = vld [vmem:[%s2980_s24 + $0x50] sm:$0xff]  ;;  %v689_v4 = vld [vmem:[%s3837_s7 + $0x18] sm:$0xff] }
  0x8c   : > { %v422_v8 = vadd.f32 %v2354_v3, %v396_v2  ;;  %v2467_v2 = vld [vmem:[%s3837_s7 + $0x1a8] sm:$0xff] }
  0x8d   : > { %v479_v13 = vadd.f32 %v2383_v6, %v453_v7  ;;  %v2392_v6 = vld [vmem:[%s2980_s24 + $0x120] sm:$0xff]  ;;  %v449_v7 = vadd.f32 %v2367_v61, %v423_v59  ;;  %v2401_v3 = vld [vmem:[%s2980_s24 + $0x148] sm:$0xff] }
  0x8e   : > { %v448_v23 = vadd.f32 %v2366_v19, %v422_v8  ;;  %v2413_v8 = vld [vmem:[%s2980_s24 + $0x188] sm:$0xff]  ;;  %v2457_v19 = vld [vmem:[%s3837_s7 + $0x158] sm:$0xff] }
  0x8f   : > { %v505_v20 = vadd.f32 %v2395_v10, %v479_v13  ;;  %v2404_v13 = vld [vmem:[%s2980_s24 + $0x160] sm:$0xff]  ;;  %v475_v18 = vadd.f32 %v2379_v1, %v449_v7 }
  0x90   : > { %v474_v33 = vadd.f32 %v2378_v24, %v448_v23  ;;  %v2388_v7 = vld [vmem:[%s2980_s24 + $0x100] sm:$0xff]  ;;  %v2485_v23 = vld [vmem:[%s3837_s7 + $0x238] sm:$0xff] }
  0x91   : > { %2433 = vmatmul.msk.f32.gmra.mxu0 %vm584_vm0, %v583_v21  ;;  %v704_v21 = vld [vmem:[%s3837_s7 + $0x90] sm:$0xff]  ;;  %v531_v28 = vadd.f32 %v2407_v17, %v505_v20  ;;  %v2482_v17 = vld [vmem:[%s3837_s7 + $0x220] sm:$0xff]  ;;  %v501_v26 = vadd.f32 %v2391_v15, %v475_v18 }
  0x92   : > { %v2462_v15 = vld [vmem:[%s3837_s7 + $0x180] sm:$0xff] }
  0x93   : > { %v557_v36 = vadd.f32 %v2419_v25, %v531_v28  ;;  %v395_v25 = vld [vmem:[%s2980_s24 + $0x8] sm:$0xff]  ;;  %v2412_v18 = vld [vmem:[%s2980_s24 + $0x180] sm:$0xff] }
  0x94   : > { %v2353_v28 = vld [vmem:[%s2980_s24 + $0x48] sm:$0xff] }
  0x95   : > { %v569_v56 = vmul.f32 0.14285715, %v557_v36  ;;  %v421_v34 = vadd.f32 %v2353_v28, %v395_v25  ;;  %v2480_v25 = vld [vmem:[%s3837_s7 + $0x210] sm:$0xff]  ;;  %v2475_v28 = vld [vmem:[%s3837_s7 + $0x1e8] sm:$0xff] }
  0xa6   : > { %v2922_v37 = vpop.f32.mrf.mxu0 }
  0xae   : > { %v2931_v40 = vpop.f32.mrf.mxu0 }
  0xb6   : > { %v2939_v44 = vpop.f32.mrf.mxu0 }
  0xbe   : > { %v2956_v51 = vpop.f32.mrf.mxu0 }
  0xc6   : > { %v2982_v60 = vpop.f32.mrf.mxu0 }
  0xc7   : > { %2434 = vmatmul.msk.f32.vlgmr.msra.gmra.mxu1 %vm726_vm1, %v2982_v60  ;;  %2438 = vmatmul.msk.f32.vlgmr.msrb.gmra.mxu0 %vm726_vm1, %v2982_v60 }
  0xc8   : > { %2442 = vmatmul.msk.f32.vlgmr.msra.gmra.mxu3 %vm726_vm1, %v2982_v60  ;;  %2450 = vmatmul.msk.f32.vlgmr.msra.gmra.mxu2 %vm726_vm1, %v2982_v60 }
  0xc9   : > { %834 = vmatpush.msra.mxu1 %v724_v63  ;;  %v503_v63 = vadd.f32 %v2393_v35, %v477_v46  ;;  %1689 = vmatpush.msra.mxu2 %v569_v56  ;;  %v394_v35 = vld [vmem:[%s2980_s24] sm:$0xff]  ;;  %v500_v46 = vadd.f32 %v2390_v27, %v474_v33  ;;  %v2472_v56 = vld [vmem:[%s3837_s7 + $0x1d0] sm:$0xff]  ;;  %v2455_v33 = vld [vmem:[%s3837_s7 + $0x148] sm:$0xff] }
  0xcb   : > { %835 = vmatpush.msra.mxu1 %v719_v0  ;;  %v450_v0 = vadd.f32 %v2368_v42, %v424_v48  ;;  %v529_v10 = vadd.f32 %v2405_v47, %v503_v63  ;;  %1690 = vmatpush.msra.mxu2 %v568_v9  ;;  %v2377_v42 = vld [vmem:[%s2980_s24 + $0xc8] sm:$0xff]  ;;  %v2352_v48 = vld [vmem:[%s2980_s24 + $0x40] sm:$0xff]  ;;  %v526_v62 = vadd.f32 %v2402_v41, %v500_v46  ;;  %v2473_v41 = vld [vmem:[%s3837_s7 + $0x1d8] sm:$0xff] }
  0xcc   : > { %v420_v59 = vadd.f32 %v2352_v48, %v394_v35  ;;  %v2493_v35 = vld [vmem:[%s3837_s7 + $0x278] sm:$0xff]  ;;  %v1709_v48 = vld [vmem:[%s3839_s9 + $0x28] sm:$0xff] }
  0xcd   : > { %836 = vmatpush.msra.mxu1 %v714_v5  ;;  %v2492_v5 = vld [vmem:[%s3837_s7 + $0x270] sm:$0xff]  ;;  %v476_v11 = vadd.f32 %v2380_v58, %v450_v0  ;;  %v555_v20 = vadd.f32 %v2417_v57, %v529_v10  ;;  %v2389_v58 = vld [vmem:[%s2980_s24 + $0x108] sm:$0xff]  ;;  %v2376_v0 = vld [vmem:[%s2980_s24 + $0xc0] sm:$0xff] }
  0xce   : > { %v3014_v12 = vpop.f32.mrf.mxu0  ;;  %1328 = vmatpush.msra.mxu3 %v2492_v5  ;;  %v2414_v57 = vld [vmem:[%s2980_s24 + $0x190] sm:$0xff]  ;;  %v1711_v46 = vld [vmem:[%s3839_s9 + $0x38] sm:$0xff] }
  0xcf   : > { %2435 = vmatmul.msk.f32.gmra.mxu1 %vm726_vm1, %v3014_v12  ;;  %2439 = vmatmul.msk.f32.gmra.mxu0 %vm726_vm1, %v3014_v12  ;;  %v567_v30 = vmul.f32 0.14285715, %v555_v20  ;;  %v552_v5 = vadd.f32 %v2414_v57, %v526_v62  ;;  %v1705_v57 = vld [vmem:[%s3839_s9 + $0x8] sm:$0xff] }
  0xd0   : > { %2443 = vmatmul.msk.f32.gmra.mxu3 %vm726_vm1, %v3014_v12  ;;  %2451 = vmatmul.msk.f32.gmra.mxu2 %vm726_vm1, %v3014_v12 }
  0xd1   : > { %837 = vmatpush.msra.mxu1 %v709_v14  ;;  %v2487_v14 = vld [vmem:[%s3837_s7 + $0x248] sm:$0xff]  ;;  %1691 = vmatpush.msra.mxu2 %v567_v30  ;;  %v564_v10 = vmul.f32 0.14285715, %v552_v5  ;;  %v2465_v30 = vld [vmem:[%s3837_s7 + $0x198] sm:$0xff] }
  0xd2   : > { %1329 = vmatpush.msra.mxu3 %v2487_v14 }
  0xd3   : > { %838 = vmatpush.msra.mxu1 %v704_v21  ;;  %v502_v21 = vadd.f32 %v2392_v6, %v476_v11 }
  0xd4   : > { %1330 = vmatpush.msra.mxu3 %v2482_v17 }
  0xd5   : > { %839 = vmatpush.msra.mxu1 %v699_v29  ;;  %v2365_v29 = vld [vmem:[%s2980_s24 + $0x88] sm:$0xff]  ;;  %v528_v31 = vadd.f32 %v2404_v13, %v502_v21  ;;  %v2400_v13 = vld [vmem:[%s2980_s24 + $0x140] sm:$0xff] }
  0xd6   : > { %v3054_v54 = vpop.f32.mrf.mxu0  ;;  %v447_v47 = vadd.f32 %v2365_v29, %v421_v34  ;;  %1331 = vmatpush.msra.mxu3 %v2477_v39  ;;  %v2490_v21 = vld [vmem:[%s3837_s7 + $0x260] sm:$0xff] }
  0xd7   : > { %2436 = vmatmul.msk.f32.gmra.mxu1 %vm726_vm1, %v3054_v54  ;;  %v554_v45 = vadd.f32 %v2416_v16, %v528_v31  ;;  %v2470_v29 = vld [vmem:[%s3837_s7 + $0x1c0] sm:$0xff] }
  0xd8   : > { %2444 = vmatmul.msk.f32.gmra.mxu3 %vm726_vm1, %v3054_v54  ;;  %2452 = vmatmul.msk.f32.gmra.mxu2 %vm726_vm1, %v3054_v54  ;;  %v473_v63 = vadd.f32 %v2377_v42, %v447_v47  ;;  %v2478_v39 = vld [vmem:[%s3837_s7 + $0x200] sm:$0xff]  ;;  %v2468_v42 = vld [vmem:[%s3837_s7 + $0x1b0] sm:$0xff] }
  0xd9   : > { %840 = vmatpush.msra.mxu1 %v694_v38  ;;  %v527_v38 = vadd.f32 %v2403_v22, %v501_v26  ;;  %v566_v61 = vmul.f32 0.14285715, %v554_v45  ;;  %1332 = vmatpush.msra.mxu3 %v2472_v56  ;;  %v2458_v45 = vld [vmem:[%s3837_s7 + $0x160] sm:$0xff]  ;;  %v1710_v47 = vld [vmem:[%s3839_s9 + $0x30] sm:$0xff] }
  0xda   : > { %v499_v6 = vadd.f32 %v2389_v58, %v473_v63  ;;  %v1706_v56 = vld [vmem:[%s3839_s9 + $0x10] sm:$0xff]  ;;  %v1704_v58 = vld [vmem:[%s3839_s9] sm:$0xff] }
  0xdb   : > { %841 = vmatpush.msra.mxu1 %v689_v4  ;;  %v553_v52 = vadd.f32 %v2415_v32, %v527_v38  ;;  %v446_v4 = vadd.f32 %v2364_v50, %v420_v59  ;;  %1692 = vmatpush.msra.mxu2 %v566_v61  ;;  %v2460_v32 = vld [vmem:[%s3837_s7 + $0x170] sm:$0xff]  ;;  %v2483_v38 = vld [vmem:[%s3837_s7 + $0x228] sm:$0xff]  ;;  %v1708_v50 = vld [vmem:[%s3839_s9 + $0x20] sm:$0xff] }
  0xdc   : > { %1333 = vmatpush.msra.mxu3 %v2467_v2  ;;  %v525_v11 = vadd.f32 %v2401_v3, %v499_v6 }
  0xdd   : > { %v565_v1 = vmul.f32 0.14285715, %v553_v52  ;;  %v472_v9 = vadd.f32 %v2376_v0, %v446_v4  ;;  %v1707_v52 = vld [vmem:[%s3839_s9 + $0x18] sm:$0xff] }
  0xde   : > { %v3093_v36 = vpop.f32.mrf.mxu0  ;;  %v551_v17 = vadd.f32 %v2413_v8, %v525_v11  ;;  %1334 = vmatpush.msra.mxu3 %v2462_v15  ;;  %v1755_v8 = vld [vmem:[%s3835_s5 + $0x10] sm:$0xff] }
  0xdf   : > { %2437 = vmatmul.msk.f32.gmra.mxu1 %vm726_vm1, %v3093_v36  ;;  %1693 = vmatpush.msra.mxu2 %v565_v1  ;;  %v498_v16 = vadd.f32 %v2388_v7, %v472_v9  ;;  %v1754_v9 = vld [vmem:[%s3835_s5 + $0x8] sm:$0xff] }
  0xe0   : > { %2445 = vmatmul.msk.f32.gmra.mxu3 %vm726_vm1, %v3093_v36  ;;  %2453 = vmatmul.msk.f32.gmra.mxu2 %vm726_vm1, %v3093_v36  ;;  %v563_v22 = vmul.f32 0.14285715, %v551_v17 }
  0xe1   : > { %1694 = vmatpush.msra.mxu2 %v564_v10  ;;  %v524_v20 = vadd.f32 %v2400_v13, %v498_v16  ;;  %1335 = vmatpush.msra.mxu3 %v2457_v19  ;;  %v1753_v10 = vld [vmem:[%s3835_s5] sm:$0xff] }
  0xe3   : > { %v550_v24 = vadd.f32 %v2412_v18, %v524_v20  ;;  %1695 = vmatpush.msra.mxu2 %v563_v22 }
  0xe5   : > { %v562_v26 = vmul.f32 0.14285715, %v550_v24 }
  0xe6   : > { %v3121_v14 = vpop.f32.mrf.mxu0 }
  0xe7   : > { %2440 = vmatmul.msk.f32.vlgmr.msrb.gmra.mxu1 %vm726_vm1, %v3054_v54  ;;  %1696 = vmatpush.msra.mxu2 %v562_v26 }
  0xe8   : > { %2494 = vmatmul.msk.f32.vlgmr.msrb.gmra.mxu3 %vm726_vm1, %v3121_v14  ;;  %2502 = vmatmul.msk.f32.vlgmr.msrb.gmra.mxu2 %vm726_vm1, %v3121_v14 }
  0xe9   : > { %1270 = vmatpush.msrb.mxu1 %v2490_v21  ;;  %1732 = vmatpush.msrb.mxu3 %v1711_v46 }
  0xeb   : > { %1271 = vmatpush.msrb.mxu1 %v2485_v23  ;;  %1733 = vmatpush.msrb.mxu3 %v1710_v47 }
  0xed   : > { %1272 = vmatpush.msrb.mxu1 %v2480_v25  ;;  %1734 = vmatpush.msrb.mxu3 %v1709_v48 }
  0xee   : > { %v3145_v27 = vpop.f32.mrf.mxu0 }
  0xef   : > { %2441 = vmatmul.msk.f32.gmra.mxu1 %vm726_vm1, %v3093_v36  ;;  %1735 = vmatpush.msrb.mxu3 %v1708_v50 }
  0xf0   : > { %2495 = vmatmul.msk.f32.gmra.mxu3 %vm726_vm1, %v3145_v27  ;;  %2503 = vmatmul.msk.f32.gmra.mxu2 %vm726_vm1, %v3145_v27 }
  0xf1   : > { %1273 = vmatpush.msrb.mxu1 %v2475_v28  ;;  %1736 = vmatpush.msrb.mxu3 %v1707_v52 }
  0xf3   : > { %1274 = vmatpush.msrb.mxu1 %v2470_v29  ;;  %1737 = vmatpush.msrb.mxu3 %v1706_v56 }
  0xf5   : > { %1275 = vmatpush.msrb.mxu1 %v2465_v30  ;;  %1738 = vmatpush.msrb.mxu3 %v1705_v57  ;;  %v1786_v57 = vld [vmem:[%s3836_s6] sm:$0xff] }
  0xf6   : > { %v3162_v31 = vpop.f32.mrf.mxu0 }
  0xf7   : > { %2446 = vmatmul.msk.f32.vlgmr.msra.gmra.mxu1 %vm726_vm1, %v2982_v60  ;;  %v1673_v60 = vld [vmem:[%s3838_s8] sm:$0xff]  ;;  %1739 = vmatpush.msrb.mxu3 %v1704_v58  ;;  %v1787_v58 = vld [vmem:[%s3836_s6 + $0x8] sm:$0xff] }
  0xf8   : > { %2496 = vmatmul.msk.f32.gmra.mxu3 %vm726_vm1, %v3162_v31  ;;  %2504 = vmatmul.msk.f32.gmra.mxu2 %vm726_vm1, %v3162_v31 }
  0xf9   : > { %1276 = vmatpush.msrb.mxu1 %v2460_v32 }
  0xfb   : > { %1277 = vmatpush.msrb.mxu1 %v2455_v33 }
  0xfd   : > { %1357 = vmatpush.msra.mxu1 %v2493_v35 }
  0xfe   : > { %v677_v34 = vpop.f32.mrf.mxu0 }
  0xff   : > { %2447 = vmatmul.msk.f32.gmra.mxu1 %vm726_vm1, %v3014_v12  ;;  %v2488_v12 = vld [vmem:[%s3837_s7 + $0x250] sm:$0xff] }
 0x100   : > { %2497 = vmatmul.msk.f32.gmra.mxu3 %vm726_vm1, %v677_v34  ;;  %2505 = vmatmul.msk.f32.gmra.mxu2 %vm726_vm1, %v677_v34 }
 0x101   : > { %1358 = vmatpush.msra.mxu1 %v2488_v12 }
 0x103   : > { %1359 = vmatpush.msra.mxu1 %v2483_v38 }
 0x105   : > { %1360 = vmatpush.msra.mxu1 %v2478_v39 }
 0x106   : > { %v680_v25 = vpop.f32.mrf.mxu0 }
 0x107   : > { %2448 = vmatmul.msk.f32.gmra.mxu1 %vm726_vm1, %v3054_v54  ;;  %v1674_v54 = vld [vmem:[%s3838_s8 + $0x8] sm:$0xff] }
 0x108   : > { %2506 = vmatmul.msk.f32.vlgmr.msra.gmra.mxu3 %vm726_vm1, %v3121_v14  ;;  %2514 = vmatmul.msk.f32.vlgmr.msra.gmra.mxu2 %vm726_vm1, %v1673_v60 }
 0x109   : > { %1361 = vmatpush.msra.mxu1 %v2473_v41 }
 0x10b   : > { %1362 = vmatpush.msra.mxu1 %v2468_v42 }
 0x10f   : > { %2449 = vmatmul.msk.f32.gmra.mxu1 %vm726_vm1, %v3093_v36  ;;  %v2463_v36 = vld [vmem:[%s3837_s7 + $0x188] sm:$0xff] }
 0x110   : > { %2507 = vmatmul.msk.f32.gmra.mxu3 %vm726_vm1, %v3145_v27  ;;  %2515 = vmatmul.msk.f32.gmra.mxu2 %vm726_vm1, %v1674_v54 }
 0x111   : > { %1363 = vmatpush.msra.mxu1 %v2463_v36 }
 0x113   : > { %1364 = vmatpush.msra.mxu1 %v2458_v45 }
 0x117   : > { %2498 = vmatmul.msk.f32.vlgmr.msrb.gmra.mxu1 %vm726_vm1, %v3121_v14 }
 0x118   : > { %2508 = vmatmul.msk.f32.gmra.mxu3 %vm726_vm1, %v3162_v31 }
 0x11f   : > { %2499 = vmatmul.msk.f32.gmra.mxu1 %vm726_vm1, %v3145_v27 }
 0x120   : > { %2509 = vmatmul.msk.f32.gmra.mxu3 %vm726_vm1, %v677_v34 }
 0x127   : > { %2500 = vmatmul.msk.f32.gmra.mxu1 %vm726_vm1, %v3162_v31 }
 0x128   : > { %2516 = vmatmul.msk.f32.vlgmr.msrb.gmra.mxu3 %vm726_vm1, %v2767_v55 }
 0x12f   : > { %2501 = vmatmul.msk.f32.gmra.mxu1 %vm726_vm1, %v677_v34 }
 0x130   : > { %2517 = vmatmul.msk.f32.gmra.mxu3 %vm726_vm1, %v2764_v53 }
 0x137   : > { %2510 = vmatmul.msk.f32.vlgmr.msra.gmra.mxu1 %vm726_vm1, %v3121_v14 }
 0x138   : > { %2518 = vmatmul.msk.f32.gmra.mxu3 %vm726_vm1, %v2760_v49 }
 0x13f   : > { %2511 = vmatmul.msk.f32.gmra.mxu1 %vm726_vm1, %v3145_v27  ;;  %v3323_v27 = vpop.f32.mrf.mxu0 }
 0x140   : > { %2519 = vmatmul.msk.f32.gmra.mxu3 %vm726_vm1, %v2755_v43  ;;  %v1756_v43 = vld [vmem:[%s3835_s5 + $0x18] sm:$0xff] }
 0x141   : > { %2558 = vmatpush.msra.mxu3 %v1756_v43  ;;  %1775 = vmatpush.msra.mxu0 %v1756_v43 }
 0x143   : > { %2559 = vmatpush.msra.mxu3 %v1755_v8  ;;  %1776 = vmatpush.msra.mxu0 %v1755_v8 }
 0x144   : > { %v3328_v30 = vpop.f32.mrf.mxu1 }
 0x145   : > { %1777 = vmatpush.msra.mxu0 %v1754_v9  ;;  %2560 = vmatpush.msra.mxu3 %v1754_v9 }
 0x147   : > { %2512 = vmatmul.msk.f32.gmra.mxu1 %vm726_vm1, %v3162_v31  ;;  %1778 = vmatpush.msra.mxu0 %v1753_v10  ;;  %v3341_v54 = vpop.f32.mrf.mxu0 }
 0x148   : > { %2561 = vmatpush.msra.mxu3 %v1753_v10 }
 0x149   : > { %2524 = vmatpush.msk.msrb.mxu0 %vm1072_vm2, %v680_v25 }
 0x14b   : > { %v3268_v59 = vpop.f32.mrf.mxu3  ;;  %v872_v55 = vpop.f32.mrf.mxu2 }
 0x14c   : > { %v1012_v61 = vmul.f32 %v872_v55, %v2922_v37  ;;  %v3330_v32 = vpop.f32.mrf.mxu1 }
 0x14e   : > { %v1015_v53 = vrot.slane %v1012_v61, 4 }
 0x14f   : > { %2513 = vmatmul.msk.f32.gmra.mxu1 %vm726_vm1, %v677_v34  ;;  %v1907_v34 = vrot.slane %v680_v25, 4  ;;  %v3345_v41 = vpop.f32.mrf.mxu0 }
 0x150   : > { %v1017_v0 = vadd.f32 %v1015_v53, %v1012_v61 }
 0x153   : > { %v3272_v62 = vpop.f32.mrf.mxu3  ;;  %v875_v63 = vpop.f32.mrf.mxu2 }
 0x154   : > { %v1013_v49 = vmul.f32 %v875_v63, %v2931_v40  ;;  %v3333_v60 = vpop.f32.mrf.mxu1 }
 0x156   : > { %v1018_v1 = vadd.f32 %v1017_v0, %v1013_v49  ;;  %v1020_v2 = vrot.slane %v1013_v49, 4 }
 0x158   : > { %v3275_v3 = vadd.f32 %v1020_v2, %v1018_v1 }
 0x15b   : > { %v3280_v4 = vpop.f32.mrf.mxu3  ;;  %v3282_v5 = vpop.f32.mrf.mxu2 }
 0x15c   : > { %3847 = vst [vmem:[#allocation2_spill] sm:$0xff] %v3280_v4  ;;  %v3335_v35 = vpop.f32.mrf.mxu1 }
 0x15d   : > { %3848 = vst [vmem:[#allocation3_spill] sm:$0xff] %v3282_v5 }
 0x163   : > { %v3284_v6 = vpop.f32.mrf.mxu3  ;;  %v3286_v7 = vpop.f32.mrf.mxu2 }
 0x164   : > { %3849 = vst [vmem:[#allocation4_spill] sm:$0xff] %v3284_v6  ;;  %v3337_v12 = vpop.f32.mrf.mxu1 }
 0x165   : > { %3850 = vst [vmem:[#allocation5_spill] sm:$0xff] %v3286_v7 }
 0x16b   : > { %v3297_v11 = vpop.f32.mrf.mxu3  ;;  %v3299_v13 = vpop.f32.mrf.mxu2 }
 0x16c   : > { %v3339_v38 = vpop.f32.mrf.mxu1 }
 0x173   : > { %v3301_v14 = vpop.f32.mrf.mxu3  ;;  %v3303_v15 = vpop.f32.mrf.mxu2 }
 0x174   : > { %v3343_v39 = vpop.f32.mrf.mxu1 }
 0x17b   : > { %v3305_v16 = vpop.f32.mrf.mxu3  ;;  %v3307_v17 = vpop.f32.mrf.mxu2 }
 0x17c   : > { %v3347_v42 = vpop.f32.mrf.mxu1 }
 0x183   : > { %v3309_v18 = vpop.f32.mrf.mxu3  ;;  %v3311_v19 = vpop.f32.mrf.mxu2 }
 0x184   : > { %v3350_v45 = vpop.f32.mrf.mxu1 }
 0x185   : > { %3853 = vst [vmem:[#allocation8_spill] sm:$0xff] %v3350_v45 }
 0x18b   : > { %v1698_v20 = vpop.f32.mrf.mxu2  ;;  %v3314_v21 = vpop.f32.mrf.mxu3 }
 0x18c   : > { %2520 = vmatmul.msk.f32.vlgmr.msra.gmra.mxu0 %vm584_vm0, %v1698_v20  ;;  %v3355_v47 = vpop.f32.mrf.mxu1 }
 0x18d   : > { %2532 = vmatpush.msk.msra.mxu0 %vm1072_vm2, %v3323_v27  ;;  %3854 = vst [vmem:[#allocation9_spill] sm:$0xff] %v3355_v47 }
 0x193   : > { %v1701_v22 = vpop.f32.mrf.mxu2  ;;  %v3317_v23 = vpop.f32.mrf.mxu3 }
 0x194   : > { %2521 = vmatmul.msk.f32.vlgmr.msra.gmra.mxu3 %vm584_vm0, %v1701_v22  ;;  %v3361_v48 = vpop.f32.mrf.mxu1 }
 0x19b   : > { %v3319_v24 = vpop.f32.mrf.mxu3 }
 0x19c   : > { %3851 = vst [vmem:[#allocation6_spill] sm:$0xff] %v3319_v24  ;;  %v3369_v50 = vpop.f32.mrf.mxu1 }
 0x1a3   : > { %v3321_v26 = vpop.f32.mrf.mxu3 }
 0x1a4   : > { %3852 = vst [vmem:[#allocation7_spill] sm:$0xff] %v3321_v26  ;;  %v3383_v52 = vpop.f32.mrf.mxu1 }
 0x1ab   : > { %v1741_v28 = vpop.f32.mrf.mxu3 }
 0x1ac   : > { %v3395_v56 = vpop.f32.mrf.mxu1 }
 0x1b3   : > { %v1744_v29 = vpop.f32.mrf.mxu3 }
 0x1bb   : > { %v1747_v31 = vpop.f32.mrf.mxu3 }
 0x1c3   : > { %v1750_v33 = vpop.f32.mrf.mxu3 }
 0x1c4   : > { %1806 = vmatpush.msrb.mxu2 %v1750_v33 }
 0x1c6   : > { %1807 = vmatpush.msrb.mxu2 %v1747_v31 }
 0x1c8   : > { %1808 = vmatpush.msrb.mxu2 %v1744_v29 }
 0x1ca   : > { %1809 = vmatpush.msrb.mxu2 %v1741_v28 }
 0x1cb   : > { %2522 = vmatmul.msk.f32.vlgmr.msrb.gmra.mxu2 %vm584_vm0, %v1786_v57 }
 0x1cc   : > { %2528 = vmatpush.msk.msra.mxu2 %vm1072_vm2, %v1907_v34 }
 0x1d3   : > { %2523 = vmatmul.msk.f32.gmra.mxu2 %vm584_vm0, %v1787_v58 }
 0x209   : > { %v1780_v36 = vpop.f32.mrf.mxu0 }
 0x20a   : > { %1989 = vrot.lane.b32.xlu1 %v1780_v36, %s2651_s11  ;;  %1903 = vrot.lane.b32.xlu0 %v1780_v36, %s2652_s12 }
 0x20b   : > { %2525 = vmatmul.msk.f32.vlgmr.msrb.gmra.mxu0 %vm1817_vm3, %v1780_v36 }
 0x212   : > { %2075 = vrot.lane.b32.xlu1 %v1780_v36, %s2653_s16 }
 0x217   : > { %v1783_v46 = vpop.f32.mrf.mxu3 }
 0x218   : > { %1991 = vrot.lane.b32.xlu2 %v1783_v46, %s2651_s11  ;;  %1905 = vrot.lane.b32.xlu0 %v1783_v46, %s2652_s12 }
 0x219   : > { %2526 = vmatmul.msk.f32.gmra.mxu0 %vm1817_vm3, %v1783_v46 }
 0x21a   : > { %898 = vrot.lane.b32.xlu1 %v3328_v30, %s2654_s17 }
 0x220   : > { %2077 = vrot.lane.b32.xlu2 %v1783_v46, %s2653_s16  ;;  %1392 = vrot.lane.b32.xlu0 %v3297_v11, %s2654_s17 }
 0x222   : > { %900 = vrot.lane.b32.xlu1 %v3330_v32, %s2654_s17 }
 0x228   : > { %1394 = vrot.lane.b32.xlu2 %v3301_v14, %s2654_s17  ;;  %1424 = vrot.lane.b32.xlu0 %v3361_v48, %s2654_s17 }
 0x22a   : > { %1456 = vrot.lane.b32.xlu1 %v3299_v13, %s2654_s17 }
 0x230   : > { %930 = vrot.lane.b32.xlu2 %v3341_v54, %s2654_s17  ;;  %1426 = vrot.lane.b32.xlu0 %v3369_v50, %s2654_s17 }
 0x232   : > { %1458 = vrot.lane.b32.xlu1 %v3303_v15, %s2654_s17 }
 0x238   : > { %932 = vrot.lane.b32.xlu2 %v3345_v41, %s2654_s17  ;;  %962 = vrot.lane.b32.xlu0 %v3268_v59, %s2654_s17 }
 0x23a   : > { %994 = vrot.lane.b32.xlu1 %v3343_v39, %s2654_s17 }
 0x240   : > { %1488 = vrot.lane.b32.xlu2 %v3314_v21, %s2654_s17  ;;  %964 = vrot.lane.b32.xlu0 %v3272_v62, %s2654_s17 }
 0x242   : > { %1578 = vrot.lane.b32.xlu1 %v3309_v18, %s2654_s17 }
 0x248   : > { %1490 = vrot.lane.b32.xlu2 %v3317_v23, %s2654_s17  ;;  %996 = vrot.lane.b32.xlu0 %v3347_v42, %s2654_s17 }
 0x24a   : > { %1604 = vrot.lane.b32.xlu1 %v3395_v56, %s2654_s17 }
 0x250   : > { %1576 = vrot.lane.b32.xlu2 %v3305_v16, %s2654_s17  ;;  %1085 = vrot.lane.b32.xlu0 %v3335_v35, %s2654_s17 }
 0x252   : > { %1111 = vrot.lane.b32.xlu1 %v3339_v38, %s2654_s17 }
 0x258   : > { %1083 = vrot.lane.b32.xlu2 %v3333_v60, %s2654_s17  ;;  %1602 = vrot.lane.b32.xlu0 %v3383_v52, %s2654_s17 }
 0x25a   : > { %1628 = vrot.lane.b32.xlu1 %v3307_v17, %s2654_s17 }
 0x260   : > { %1630 = vrot.lane.b32.xlu2 %v3311_v19, %s2654_s17  ;;  %1109 = vrot.lane.b32.xlu0 %v3337_v12, %s2654_s17 }
 0x262   : > { %1135 = vrot.lane.b32.xlu1 %v3280_v4, %s2654_s17 }
 0x268   : > { %1137 = vrot.lane.b32.xlu2 %v3284_v6, %s2654_s17  ;;  %1656 = vrot.lane.b32.xlu0 %v3321_v26, %s2654_s17 }
 0x26a   : > { %1161 = vrot.lane.b32.xlu1 %v3350_v45, %s2654_s17 }
 0x270   : > { %1654 = vrot.lane.b32.xlu2 %v3319_v24, %s2654_s17  ;;  %1163 = vrot.lane.b32.xlu0 %v3355_v47, %s2654_s17 }
 0x272   : > { %v1992_v53 = vpop.permute.xlu2 %1991 }
 0x27c   : > { %v1990_v55 = vpop.permute.xlu1 %1989  ;;  %v1904_v61 = vpop.permute.xlu0 %1903 }
 0x27d   : > { %2529 = vmatmul.msk.f32.vlgmr.msra.gmra.mxu2 %vm1817_vm3, %v1904_v61  ;;  %2533 = vmatmul.msk.f32.vlgmr.msra.gmra.mxu0 %vm1817_vm3, %v1990_v55 }
 0x285   : > { %2534 = vmatmul.msk.f32.gmra.mxu0 %vm1817_vm3, %v1992_v53 }
 0x288   : > { %v1844_v0 = vpop.f32.mrf.mxu0 }
 0x289   : > { %v1850_v49 = vmul.f32 0.5, %v1844_v0 }
 0x28a   : > { %v1906_v63 = vpop.permute.xlu0 %1905 }
 0x28b   : > { %2530 = vmatmul.msk.f32.gmra.mxu2 %vm1817_vm3, %v1906_v63  ;;  %v1852_v43 = vsel %vm726_vm1, %v1850_v49, -inf }
 0x296   : > { %v1847_v1 = vpop.f32.mrf.mxu0 }
 0x297   : > { %v1851_v2 = vmul.f32 0.5, %v1847_v1 }
 0x299   : > { %v1853_v8 = vsel %vm726_vm1, %v1851_v2, -inf }
 0x29a   : > { %v1854_v9 = vmax.f32 %v1852_v43, %v1853_v8 }
 0x29c   : > { %v1855_v10 = vrot.slane %v1854_v9, 4 }
 0x29e   : > { %v1856_v20 = vmax.f32 %v1854_v9, %v1855_v10  ;;  %v3443_v10 = vpop.f32.mrf.mxu2 }
 0x2a0   : > { %v1857_v22 = vrot.slane %v1856_v20, 2 }
 0x2a2   : > { %v1858_v25 = vmax.f32 %v1856_v20, %v1857_v22 }
 0x2a4   : > { %v1859_v28 = vrot.slane %v1858_v25, 1 }
 0x2a6   : > { %v1860_v29 = vmax.f32 %v1858_v25, %v1859_v28  ;;  %v3447_v22 = vpop.f32.mrf.mxu2 }
 0x2a8   : > { %v1861_v31 = vsub.f32 %v1850_v49, %v1860_v29  ;;  %v1862_v33 = vsub.f32 %v1851_v2, %v1860_v29 }
 0x2aa   : > { %v1863_v34 = vmul.f32 1.442695, %v1861_v31  ;;  %v1865_v36 = vmul.f32 1.442695, %v1862_v33 }
 0x2ac   : > { %2579 = vpow2.f32 %v1863_v34 }
 0x2ad   : > { %2581 = vpow2.f32 %v1865_v36 }
 0x2b2   : > { %v2580_v46 = vpop.eup %2579 }
 0x2b3   : > { %v2582_v57 = vpop.eup %2581  ;;  %v1867_v58 = vsel %vm726_vm1, %v2580_v46, 0.0 }
 0x2b4   : > { %v1868_v55 = vsel %vm726_vm1, %v2582_v57, 0.0 }
 0x2b5   : > { %v1869_v61 = vadd.f32 %v1868_v55, %v1867_v58 }
 0x2b7   : > { %v1870_v53 = vrot.slane %v1869_v61, 4 }
 0x2b9   : > { %v1871_v63 = vadd.f32 %v1870_v53, %v1869_v61 }
 0x2bb   : > { %v1872_v0 = vrot.slane %v1871_v63, 2 }
 0x2bd   : > { %v1873_v1 = vadd.f32 %v1872_v0, %v1871_v63 }
 0x2bf   : > { %v1874_v43 = vrot.slane %v1873_v1, 1 }
 0x2c1   : > { %v1875_v8 = vadd.f32 %v1874_v43, %v1873_v1 }
 0x2c3   : > { %2583 = vrcp.f32 %v1875_v8 }
 0x2c9   : > { %v2584_v49 = vpop.eup %2583 }
 0x2ca   : > { %v1878_v2 = vmul.f32 %v2584_v49, %v2582_v57  ;;  %v1877_v9 = vmul.f32 %v2584_v49, %v2580_v46 }
 0x2cc   : > { %1897 = vmatpush.msrb.mxu1 %v1878_v2 }
 0x2ce   : > { %1898 = vmatpush.msrb.mxu1 %v1877_v9 }
 0x2cf   : > { %2527 = vmatmul.msk.f32.vlgmr.msrb.gmra.mxu1 %vm1879_vm4, %v3443_v10 }
 0x2fa   : > { %v2017_v20 = vpop.f32.mrf.mxu0 }
 0x2fb   : > { %v2023_v25 = vmul.f32 0.5, %v2017_v20 }
 0x2fd   : > { %v2025_v31 = vsel %vm726_vm1, %v2023_v25, -inf }
 0x300   : > { %v1931_v34 = vpop.f32.mrf.mxu2 }
 0x301   : > { %v1937_v55 = vmul.f32 0.5, %v1931_v34 }
 0x302   : > { %v2020_v28 = vpop.f32.mrf.mxu0 }
 0x303   : > { %v2024_v29 = vmul.f32 0.5, %v2020_v28  ;;  %v1939_v1 = vsel %vm726_vm1, %v1937_v55, -inf }
 0x305   : > { %v2026_v33 = vsel %vm726_vm1, %v2024_v29, -inf }
 0x306   : > { %v2027_v36 = vmax.f32 %v2025_v31, %v2026_v33 }
 0x308   : > { %v2028_v46 = vrot.slane %v2027_v36, 4 }
 0x30a   : > { %v2029_v57 = vmax.f32 %v2027_v36, %v2028_v46 }
 0x30c   : > { %v2030_v58 = vrot.slane %v2029_v57, 2 }
 0x30e   : > { %v2031_v61 = vmax.f32 %v2029_v57, %v2030_v58  ;;  %v1934_v53 = vpop.f32.mrf.mxu2 }
 0x30f   : > { %v1938_v63 = vmul.f32 0.5, %v1934_v53 }
 0x310   : > { %v2032_v0 = vrot.slane %v2031_v61, 1 }
 0x311   : > { %v1940_v43 = vsel %vm726_vm1, %v1938_v63, -inf }
 0x312   : > { %v2033_v8 = vmax.f32 %v2031_v61, %v2032_v0  ;;  %v1941_v49 = vmax.f32 %v1939_v1, %v1940_v43 }
 0x314   : > { %v2034_v2 = vsub.f32 %v2023_v25, %v2033_v8  ;;  %v2035_v9 = vsub.f32 %v2024_v29, %v2033_v8  ;;  %v1942_v20 = vrot.slane %v1941_v49, 4 }
 0x316   : > { %v2036_v28 = vmul.f32 1.442695, %v2034_v2  ;;  %v2038_v5 = vmul.f32 1.442695, %v2035_v9  ;;  %v1943_v31 = vmax.f32 %v1941_v49, %v1942_v20 }
 0x318   : > { %2585 = vpow2.f32 %v2036_v28  ;;  %v1944_v33 = vrot.slane %v1943_v31, 2 }
 0x319   : > { %2587 = vpow2.f32 %v2038_v5 }
 0x31a   : > { %v1945_v34 = vmax.f32 %v1943_v31, %v1944_v33 }
 0x31c   : > { %v1946_v36 = vrot.slane %v1945_v34, 1 }
 0x31e   : > { %v2586_v46 = vpop.eup %2585  ;;  %v1947_v57 = vmax.f32 %v1945_v34, %v1946_v36 }
 0x31f   : > { %v2588_v58 = vpop.eup %2587  ;;  %v2040_v53 = vsel %vm726_vm1, %v2586_v46, 0.0 }
 0x320   : > { %v2041_v7 = vsel %vm726_vm1, %v2588_v58, 0.0  ;;  %v1948_v61 = vsub.f32 %v1937_v55, %v1947_v57  ;;  %v1949_v0 = vsub.f32 %v1938_v63, %v1947_v57 }
 0x321   : > { %v2042_v25 = vadd.f32 %v2041_v7, %v2040_v53 }
 0x322   : > { %v1950_v29 = vmul.f32 1.442695, %v1948_v61  ;;  %v1952_v1 = vmul.f32 1.442695, %v1949_v0 }
 0x323   : > { %v2043_v43 = vrot.slane %v2042_v25, 4 }
 0x324   : > { %2589 = vpow2.f32 %v1950_v29 }
 0x325   : > { %v2044_v8 = vadd.f32 %v2043_v43, %v2042_v25  ;;  %2591 = vpow2.f32 %v1952_v1 }
 0x327   : > { %v2045_v49 = vrot.slane %v2044_v8, 2 }
 0x329   : > { %v2046_v5 = vadd.f32 %v2045_v49, %v2044_v8  ;;  %v1966_v8 = vrot.slane %v3443_v10, 4  ;;  %v2079_v49 = vrot.slane %v3323_v27, 4 }
 0x32a   : > { %v2590_v2 = vpop.eup %2589 }
 0x32b   : > { %v2592_v9 = vpop.eup %2591  ;;  %v2047_v20 = vrot.slane %v2046_v5, 1  ;;  %v1954_v28 = vsel %vm726_vm1, %v2590_v2, 0.0 }
 0x32c   : > { %v1955_v31 = vsel %vm726_vm1, %v2592_v9, 0.0 }
 0x32d   : > { %v1956_v33 = vadd.f32 %v1955_v31, %v1954_v28  ;;  %v2048_v34 = vadd.f32 %v2047_v20, %v2046_v5 }
 0x32f   : > { %v1957_v55 = vrot.slane %v1956_v33, 4  ;;  %2593 = vrcp.f32 %v2048_v34 }
 0x331   : > { %v1958_v7 = vadd.f32 %v1957_v55, %v1956_v33 }
 0x333   : > { %v1959_v63 = vrot.slane %v1958_v7, 2 }
 0x335   : > { %v2594_v36 = vpop.eup %2593  ;;  %v1960_v57 = vadd.f32 %v1959_v63, %v1958_v7  ;;  %v1393_v63 = vpop.permute.xlu0 %1392 }
 0x336   : > { %v2051_v53 = vmul.f32 %v2594_v36, %v2588_v58  ;;  %v2050_v0 = vmul.f32 %v2594_v36, %v2586_v46  ;;  %v2076_v46 = vpop.permute.xlu1 %2075  ;;  %v2078_v58 = vpop.permute.xlu2 %2077 }
 0x337   : > { %v1961_v61 = vrot.slane %v1960_v57, 1 }
 0x338   : > { %2069 = vmatpush.msra.mxu1 %v2051_v53 }
 0x339   : > { %v1962_v25 = vadd.f32 %v1961_v61, %v1960_v57 }
 0x33a   : > { %2070 = vmatpush.msra.mxu1 %v2050_v0 }
 0x33b   : > { %2535 = vmatmul.msk.f32.vlgmr.msra.gmra.mxu1 %vm1879_vm4, %v3447_v22  ;;  %2595 = vrcp.f32 %v1962_v25 }
 0x33e   : > { %v899_v53 = vpop.permute.xlu1 %898  ;;  %v1395_v25 = vpop.permute.xlu2 %1394 }
 0x33f   : > { %v1399_v24 = vmul.f32 %v1395_v25, %v2956_v51 }
 0x341   : > { %v2596_v29 = vpop.eup %2595 }
 0x342   : > { %v1965_v1 = vmul.f32 %v2596_v29, %v2592_v9  ;;  %v1964_v43 = vmul.f32 %v2596_v29, %v2590_v2 }
 0x344   : > { %1983 = vmatpush.msrb.mxu3 %v1965_v1 }
 0x346   : > { %1984 = vmatpush.msrb.mxu3 %v1964_v43  ;;  %v1425_v43 = vpop.permute.xlu0 %1424 }
 0x347   : > { %2531 = vmatmul.msk.f32.vlgmr.msrb.gmra.mxu3 %vm1879_vm4, %v1966_v8  ;;  %v901_v8 = vpop.permute.xlu1 %900 }
 0x348   : > { %2536 = vmatpush.msk.msra.mxu3 %vm1072_vm2, %v2079_v49  ;;  %v905_v25 = vmul.f32 %v901_v8, %v2931_v40 }
 0x34f   : > { %2537 = vmatmul.msk.f32.vlgmr.msra.gmra.mxu3 %vm1817_vm3, %v2076_v46 }
 0x357   : > { %2538 = vmatmul.msk.f32.gmra.mxu3 %vm1817_vm3, %v2078_v58 }
 0x3ca   : > { %v3465_v5 = vpop.f32.mrf.mxu3 }
 0x3cb   : > { %3855 = vst [vmem:[#allocation10_spill] sm:$0xff] %v3465_v5  ;;  %v1430_v5 = vmul.f32 %v1425_v43, %v2939_v44  ;;  %v1411_v43 = vmul.f32 %v3369_v50, %v2956_v51 }
 0x3d2   : > { %v2103_v9 = vpop.f32.mrf.mxu3 }
 0x3d3   : > { %v2109_v20 = vmul.f32 0.5, %v2103_v9  ;;  %v3475_v9 = vpop.permute.xlu2 %930 }
 0x3d4   : > { %v936_v8 = vmul.f32 %v3475_v9, %v2922_v37 }
 0x3d5   : > { %v2111_v10 = vsel %vm726_vm1, %v2109_v20, -inf }
 0x3da   : > { %v2106_v2 = vpop.f32.mrf.mxu3 }
 0x3db   : > { %v2110_v28 = vmul.f32 0.5, %v2106_v2  ;;  %v884_v2 = vmul.f32 %v3328_v30, %v2922_v37  ;;  %v885_v30 = vmul.f32 %v3330_v32, %v2931_v40  ;;  %v3497_v32 = vpop.permute.xlu2 %932 }
 0x3dd   : > { %v2112_v27 = vsel %vm726_vm1, %v2110_v28, -inf }
 0x3de   : > { %v2113_v31 = vmax.f32 %v2111_v10, %v2112_v27  ;;  %v916_v27 = vmul.f32 %v3341_v54, %v2922_v37  ;;  %v917_v54 = vmul.f32 %v3345_v41, %v2931_v40  ;;  %v892_v41 = vrot.slane %v885_v30, 4 }
 0x3e0   : > { %v2114_v33 = vrot.slane %v2113_v31, 4 }
 0x3e2   : > { %v2115_v34 = vmax.f32 %v2113_v31, %v2114_v33  ;;  %v1427_v31 = vpop.permute.xlu0 %1426 }
 0x3e4   : > { %v2116_v55 = vrot.slane %v2115_v34, 2 }
 0x3e6   : > { %v2117_v7 = vmax.f32 %v2115_v34, %v2116_v55  ;;  %v1378_v34 = vmul.f32 %v3297_v11, %v2939_v44  ;;  %v887_v55 = vrot.slane %v884_v2, 4 }
 0x3e8   : > { %v2118_v36 = vrot.slane %v2117_v7, 1  ;;  %v889_v11 = vadd.f32 %v887_v55, %v884_v2 }
 0x3ea   : > { %v2119_v57 = vmax.f32 %v2117_v7, %v2118_v36  ;;  %v890_v47 = vadd.f32 %v889_v11, %v885_v30  ;;  %v1433_v30 = vrot.slane %v1430_v5, 4  ;;  %v1406_v11 = vrot.slane %v1399_v24, 4 }
 0x3ec   : > { %v2120_v61 = vsub.f32 %v2109_v20, %v2119_v57  ;;  %v2121_v0 = vsub.f32 %v2110_v28, %v2119_v57  ;;  %v1398_v28 = vmul.f32 %v1393_v63, %v2939_v44  ;;  %v919_v57 = vrot.slane %v916_v27, 4  ;;  %v1457_v63 = vpop.permute.xlu1 %1456 }
 0x3ee   : > { %v2122_v29 = vmul.f32 1.442695, %v2120_v61  ;;  %v2124_v1 = vmul.f32 1.442695, %v2121_v0  ;;  %v1401_v7 = vrot.slane %v1398_v28, 4  ;;  %v948_v61 = vmul.f32 %v3268_v59, %v2922_v37 }
 0x3ef   : > { %v1379_v59 = vmul.f32 %v3301_v14, %v2956_v51 }
 0x3f0   : > { %2597 = vpow2.f32 %v2122_v29  ;;  %v1381_v29 = vrot.slane %v1378_v34, 4  ;;  %v951_v45 = vrot.slane %v948_v61, 4 }
 0x3f1   : > { %2599 = vpow2.f32 %v2124_v1  ;;  %v1410_v1 = vmul.f32 %v3361_v48, %v2939_v44 }
 0x3f2   : > { %v1383_v2 = vadd.f32 %v1381_v29, %v1378_v34  ;;  %v953_v34 = vadd.f32 %v951_v45, %v948_v61  ;;  %v912_v61 = vrot.slane %v905_v25, 4 }
 0x3f6   : > { %v3469_v49 = vpop.eup %2597 }
 0x3f7   : > { %v3471_v46 = vpop.eup %2599  ;;  %v2126_v58 = vsel %vm726_vm1, %v3469_v49, 0.0 }
 0x3f8   : > { %v2127_v20 = vsel %vm726_vm1, %v3471_v46, 0.0 }
 0x3f9   : > { %v2128_v10 = vadd.f32 %v2127_v20, %v2126_v58  ;;  %v904_v58 = vmul.f32 %v899_v53, %v2922_v37  ;;  %v1403_v20 = vadd.f32 %v1401_v7, %v1398_v28  ;;  %v1442_v53 = vmul.f32 %v3299_v13, %v2939_v44 }
 0x3fa   : > { %v1413_v28 = vrot.slane %v1410_v1, 4  ;;  %v1431_v13 = vmul.f32 %v1427_v31, %v2956_v51 }
 0x3fb   : > { %v2129_v33 = vrot.slane %v2128_v10, 4  ;;  %v907_v55 = vrot.slane %v904_v58, 4  ;;  %v1404_v7 = vadd.f32 %v1403_v20, %v1399_v24  ;;  %v1445_v29 = vrot.slane %v1442_v53, 4 }
 0x3fc   : > { %v1418_v24 = vrot.slane %v1411_v43, 4 }
 0x3fd   : > { %v2130_v36 = vadd.f32 %v2129_v33, %v2128_v10  ;;  %v921_v33 = vadd.f32 %v919_v57, %v916_v27  ;;  %v924_v27 = vrot.slane %v917_v54, 4  ;;  %v1384_v57 = vadd.f32 %v1383_v2, %v1379_v59 }
 0x3fe   : > { %v909_v20 = vadd.f32 %v907_v55, %v904_v58  ;;  %v1408_v6 = vadd.f32 %v1406_v11, %v1404_v7  ;;  %v1435_v2 = vadd.f32 %v1433_v30, %v1430_v5  ;;  %v1438_v58 = vrot.slane %v1431_v13, 4 }
 0x3ff   : > { %v2131_v0 = vrot.slane %v2130_v36, 2  ;;  %v922_v48 = vadd.f32 %v921_v33, %v917_v54  ;;  %v1415_v33 = vadd.f32 %v1413_v28, %v1410_v1  ;;  %v894_v54 = vadd.f32 %v892_v41, %v890_v47  ;;  %v1489_v28 = vpop.permute.xlu2 %1488 }
 0x400   : > { %v910_v45 = vadd.f32 %v909_v20, %v905_v25  ;;  %v1447_v1 = vadd.f32 %v1445_v29, %v1442_v53  ;;  %v1462_v47 = vmul.f32 %v1457_v63, %v2939_v44  ;;  %v1436_v31 = vadd.f32 %v1435_v2, %v1431_v13 }
 0x401   : > { %v2132_v10 = vadd.f32 %v2131_v0, %v2130_v36  ;;  %v963_v36 = vpop.permute.xlu0 %962  ;;  %v1386_v0 = vrot.slane %v1379_v59, 4  ;;  %v926_v4 = vadd.f32 %v924_v27, %v922_v48  ;;  %v1443_v59 = vmul.f32 %v3303_v15, %v2956_v51 }
 0x402   : > { %v1416_v50 = vadd.f32 %v1415_v33, %v1411_v43  ;;  %v3512_v48 = vmul.f32 0.5, %v894_v54  ;;  %v3518_v15 = vmul.f32 %v3272_v62, %v2931_v40  ;;  %v3520_v5 = vmul.f32 0.5, %v1408_v6  ;;  %v1366_v43 = vpop.f32.mrf.mxu1 }
 0x403   : > { %v2133_v26 = vrot.slane %v2132_v10, 1  ;;  %v3514_v27 = vmul.f32 0.5, %v926_v4  ;;  %v1448_v55 = vadd.f32 %v1447_v1, %v1443_v59  ;;  %v1450_v53 = vrot.slane %v1443_v59, 4 }
 0x404   : > { %v1474_v63 = vmul.f32 %v3314_v21, %v2939_v44  ;;  %v1465_v30 = vrot.slane %v1462_v47, 4  ;;  %v1440_v11 = vadd.f32 %v1438_v58, %v1436_v31  ;;  %v968_v62 = vmul.f32 %v963_v36, %v2922_v37 }
 0x405   : > { %v2134_v14 = vadd.f32 %v2133_v26, %v2132_v10  ;;  %v1459_v26 = vpop.permute.xlu1 %1458  ;;  %v1388_v10 = vadd.f32 %v1386_v0, %v1384_v57  ;;  %v939_v57 = vrot.slane %v936_v8, 4  ;;  %v914_v0 = vadd.f32 %v912_v61, %v910_v45 }
 0x406   : > { %v954_v25 = vadd.f32 %v953_v34, %v3518_v15  ;;  %v2138_v29 = vrot.slane %v3447_v22, 4  ;;  %v956_v33 = vrot.slane %v3518_v15, 4  ;;  %v1452_v13 = vadd.f32 %v1450_v53, %v1448_v55 }
 0x407   : > { %2601 = vrcp.f32 %v2134_v14  ;;  %v3522_v9 = vmul.f32 0.5, %v1388_v10  ;;  %v1420_v14 = vadd.f32 %v1418_v24, %v1416_v50  ;;  %v980_v54 = vmul.f32 %v3343_v39, %v2922_v37  ;;  %v1491_v61 = vpop.permute.xlu2 %1490 }
 0x408   : > { %v1463_v36 = vmul.f32 %v1459_v26, %v2956_v51  ;;  %v941_v34 = vadd.f32 %v939_v57, %v936_v8  ;;  %v3543_v59 = vmul.f32 0.5, %v914_v0  ;;  %v1467_v22 = vadd.f32 %v1465_v30, %v1462_v47 }
 0x409   : > { %v965_v4 = vpop.permute.xlu0 %964  ;;  %v1518_v21 = vmax.f32 %v3522_v9, %v3520_v5  ;;  %v3539_v20 = vmul.f32 0.5, %v1420_v14  ;;  %v3545_v50 = vmul.f32 0.5, %v1440_v11  ;;  %v971_v2 = vrot.slane %v968_v62, 4 }
 0x40a   : > { %v1475_v39 = vmul.f32 %v3317_v23, %v2956_v51  ;;  %v1468_v8 = vadd.f32 %v1467_v22, %v1463_v36  ;;  %v1470_v1 = vrot.slane %v1463_v36, 4  ;;  %v969_v31 = vmul.f32 %v965_v4, %v2931_v40  ;;  %v1369_v4 = vpop.f32.mrf.mxu1 }
 0x40b   : > { %v1519_v45 = vmax.f32 %v1518_v21, %v3539_v20  ;;  %v983_v58 = vrot.slane %v980_v54, 4  ;;  %v1506_v47 = vmul.f32 %v1366_v43, %v2939_v44  ;;  %v3553_v55 = vmul.f32 0.5, %v1452_v13 }
 0x40c   : > { %v1024_v23 = vmax.f32 %v3512_v48, %v3543_v59  ;;  %v1482_v57 = vrot.slane %v1475_v39, 4  ;;  %v1472_v11 = vadd.f32 %v1470_v1, %v1468_v8  ;;  %v958_v43 = vadd.f32 %v956_v33, %v954_v25 }
 0x40d   : > { %v2602_v41 = vpop.eup %2601  ;;  %v995_v10 = vpop.permute.xlu1 %994  ;;  %v1520_v53 = vmax.f32 %v1519_v45, %v3545_v50  ;;  %v1509_v21 = vrot.slane %v1506_v47, 4  ;;  %v985_v13 = vadd.f32 %v983_v58, %v980_v54 }
 0x40e   : > { %v2137_v7 = vmul.f32 %v2602_v41, %v3471_v46  ;;  %v2136_v6 = vmul.f32 %v2602_v41, %v3469_v49  ;;  %v937_v46 = vmul.f32 %v3497_v32, %v2931_v40  ;;  %v1477_v49 = vrot.slane %v1474_v63, 4 }
 0x40f   : > { %v1494_v32 = vmul.f32 %v1489_v28, %v2939_v44  ;;  %v1000_v28 = vmul.f32 %v995_v10, %v2922_v37  ;;  %v1495_v37 = vmul.f32 %v1491_v61, %v2956_v51  ;;  %v976_v44 = vrot.slane %v969_v31, 4 }
 0x410   : > { %2155 = vmatpush.msrb.mxu1 %v2137_v7  ;;  %v942_v26 = vadd.f32 %v941_v34, %v937_v46  ;;  %v944_v24 = vrot.slane %v937_v46, 4  ;;  %v1479_v41 = vadd.f32 %v1477_v49, %v1474_v63  ;;  %v973_v7 = vadd.f32 %v971_v2, %v968_v62 }
 0x411   : > { %v1497_v15 = vrot.slane %v1494_v32, 4  ;;  %v997_v30 = vpop.permute.xlu0 %996  ;;  %v1003_v63 = vrot.slane %v1000_v28, 4  ;;  %v981_v46 = vmul.f32 %v3347_v42, %v2931_v40  ;;  %v1025_v62 = vmax.f32 %v1024_v23, %v3514_v27 }
 0x412   : > { %2156 = vmatpush.msrb.mxu1 %v2136_v6  ;;  %v1480_v14 = vadd.f32 %v1479_v41, %v1475_v39  ;;  %v946_v0 = vadd.f32 %v944_v24, %v942_v26  ;;  %v974_v6 = vadd.f32 %v973_v7, %v969_v31  ;;  %v1521_v36 = vmax.f32 %v1520_v53, %v3553_v55 }
 0x413   : > { %2539 = vmatmul.msk.f32.vlgmr.msrb.gmra.mxu1 %vm1879_vm4, %v2138_v29  ;;  %v1499_v29 = vadd.f32 %v1497_v15, %v1494_v32  ;;  %v1001_v49 = vmul.f32 %v997_v30, %v2931_v40  ;;  %v1507_v10 = vmul.f32 %v1369_v4, %v2956_v51  ;;  %v1502_v39 = vrot.slane %v1495_v37, 4 }
 0x414   : > { %v1484_v34 = vadd.f32 %v1482_v57, %v1480_v14  ;;  %v3565_v22 = vmul.f32 0.5, %v946_v0  ;;  %v3567_v25 = vmul.f32 0.5, %v1472_v11  ;;  %v1005_v33 = vadd.f32 %v1003_v63, %v1000_v28 }
 0x415   : > { %v1500_v2 = vadd.f32 %v1499_v29, %v1495_v37  ;;  %v978_v42 = vadd.f32 %v976_v44, %v974_v6  ;;  %v986_v26 = vadd.f32 %v985_v13, %v981_v46  ;;  %v988_v32 = vrot.slane %v981_v46, 4 }
 0x416   : > { %v1511_v54 = vadd.f32 %v1509_v21, %v1506_v47  ;;  %v1522_v24 = vmax.f32 %v1521_v36, %v3567_v25  ;;  %v1026_v45 = vmax.f32 %v1025_v62, %v3565_v22  ;;  %v1006_v61 = vadd.f32 %v1005_v33, %v1001_v49 }
 0x417   : > { %v1008_v40 = vrot.slane %v1001_v49, 4  ;;  %v959_v8 = vmul.f32 0.5, %v958_v43  ;;  %v3571_v1 = vmul.f32 0.5, %v1484_v34  ;;  %v1514_v31 = vrot.slane %v1507_v10, 4 }
 0x418   : > { %v1512_v51 = vadd.f32 %v1511_v54, %v1507_v10  ;;  %v1504_v58 = vadd.f32 %v1502_v39, %v1500_v2  ;;  %v3573_v41 = vmul.f32 0.5, %v978_v42  ;;  %v990_v15 = vadd.f32 %v988_v32, %v986_v26 }
 0x419   : > { %v1523_v28 = vmax.f32 %v1522_v24, %v3571_v1  ;;  %v1027_v23 = vmax.f32 %v1026_v45, %v959_v8  ;;  %v1010_v53 = vadd.f32 %v1008_v40, %v1006_v61  ;;  %v3592_v6 = vmul.f32 0.5, %v3275_v3 }
 0x41a   : > { %v1516_v47 = vadd.f32 %v1514_v31, %v1512_v51  ;;  %v3576_v7 = vmul.f32 0.5, %v1504_v58  ;;  %v3579_v57 = vmul.f32 0.5, %v990_v15 }
 0x41b   : > { %v1028_v14 = vmax.f32 %v1027_v23, %v3573_v41  ;;  %v3582_v37 = vmul.f32 0.5, %v1010_v53 }
 0x41c   : > { %v1524_v0 = vmax.f32 %v1523_v28, %v3576_v7  ;;  %v3584_v30 = vmul.f32 0.5, %v1516_v47 }
 0x41d   : > { %v1029_v4 = vmax.f32 %v1028_v14, %v3579_v57 }
 0x41e   : > { %v3588_v11 = vmax.f32 %v1524_v0, %v3584_v30 }
 0x41f   : > { %v1030_v63 = vmax.f32 %v1029_v4, %v3582_v37 }
 0x420   : > { %v1526_v44 = vsub.f32 %v3522_v9, %v3588_v11  ;;  %v1529_v46 = vsub.f32 %v3520_v5, %v3588_v11  ;;  %v1532_v3 = vsub.f32 %v3539_v20, %v3588_v11  ;;  %v1535_v49 = vsub.f32 %v3545_v50, %v3588_v11 }
 0x421   : > { %v3597_v43 = vmax.f32 %v1030_v63, %v3592_v6  ;;  %v1541_v50 = vsub.f32 %v3567_v25, %v3588_v11  ;;  %v1547_v31 = vsub.f32 %v3576_v7, %v3588_v11  ;;  %v1550_v47 = vsub.f32 %v3584_v30, %v3588_v11 }
 0x422   : > { %v1527_v21 = vmul.f32 1.442695, %v1526_v44  ;;  %v1530_v13 = vmul.f32 1.442695, %v1529_v46  ;;  %v1533_v34 = vmul.f32 1.442695, %v1532_v3 }
 0x423   : > { %v1032_v29 = vsub.f32 %v3512_v48, %v3597_v43  ;;  %v1035_v62 = vsub.f32 %v3543_v59, %v3597_v43  ;;  %v1038_v5 = vsub.f32 %v3514_v27, %v3597_v43  ;;  %v1536_v10 = vmul.f32 1.442695, %v1535_v49 }
 0x424   : > { %2603 = vpow2.f32 %v1527_v21  ;;  %v1538_v59 = vsub.f32 %v3553_v55, %v3588_v11  ;;  %v1041_v39 = vsub.f32 %v3565_v22, %v3597_v43  ;;  %v1044_v32 = vsub.f32 %v959_v8, %v3597_v43 }
 0x425   : > { %v1033_v36 = vmul.f32 1.442695, %v1032_v29  ;;  %2605 = vpow2.f32 %v1530_v13  ;;  %v1036_v9 = vmul.f32 1.442695, %v1035_v62  ;;  %v1039_v2 = vmul.f32 1.442695, %v1038_v5 }
 0x426   : > { %v1539_v27 = vmul.f32 1.442695, %v1538_v59  ;;  %v1042_v55 = vmul.f32 1.442695, %v1041_v39  ;;  %v1542_v24 = vmul.f32 1.442695, %v1541_v50  ;;  %v1544_v22 = vsub.f32 %v3571_v1, %v3588_v11  ;;  %v1579_v50 = vpop.permute.xlu1 %1578 }
 0x427   : > { %2607 = vpow2.f32 %v1033_v36  ;;  %v1045_v61 = vmul.f32 1.442695, %v1044_v32  ;;  %v1047_v40 = vsub.f32 %v3573_v41, %v3597_v43  ;;  %v1050_v23 = vsub.f32 %v3579_v57, %v3597_v43 }
 0x428   : > { %2609 = vpow2.f32 %v1036_v9  ;;  %v1545_v58 = vmul.f32 1.442695, %v1544_v22  ;;  %v1548_v14 = vmul.f32 1.442695, %v1547_v31  ;;  %v1053_v4 = vsub.f32 %v3582_v37, %v3597_v43 }
 0x429   : > { %2611 = vpow2.f32 %v1533_v34  ;;  %v1048_v28 = vmul.f32 1.442695, %v1047_v40  ;;  %v1051_v63 = vmul.f32 1.442695, %v1050_v23  ;;  %v1551_v46 = vmul.f32 1.442695, %v1550_v47 }
 0x42a   : > { %v3611_v48 = vpop.eup %2603  ;;  %2613 = vpow2.f32 %v1536_v10  ;;  %v1054_v11 = vmul.f32 1.442695, %v1053_v4  ;;  %v1056_v29 = vsub.f32 %v3592_v6, %v3597_v43 }
 0x42b   : > { %v3615_v20 = vpop.eup %2605  ;;  %2615 = vpow2.f32 %v1039_v2 }
 0x42c   : > { %v1553_v42 = vadd.f32 %v3615_v20, %v3611_v48  ;;  %2617 = vpow2.f32 %v1539_v27  ;;  %v1057_v36 = vmul.f32 1.442695, %v1056_v29 }
 0x42d   : > { %v3621_v33 = vpop.eup %2607  ;;  %2619 = vpow2.f32 %v1042_v55 }
 0x42e   : > { %v3625_v26 = vpop.eup %2609  ;;  %2621 = vpow2.f32 %v1542_v24  ;;  %v1086_v24 = vpop.permute.xlu0 %1085 }
 0x42f   : > { %v3628_v54 = vpop.eup %2611  ;;  %v1059_v45 = vadd.f32 %v3625_v26, %v3621_v33  ;;  %2623 = vpow2.f32 %v1045_v61 }
 0x430   : > { %v1554_v25 = vadd.f32 %v3628_v54, %v1553_v42  ;;  %v3637_v51 = vpop.eup %2613  ;;  %2625 = vpow2.f32 %v1545_v58  ;;  %v1577_v42 = vpop.permute.xlu2 %1576 }
 0x431   : > { %v3639_v8 = vpop.eup %2615  ;;  %2627 = vpow2.f32 %v1048_v28 }
 0x432   : > { %v1555_v1 = vadd.f32 %v3637_v51, %v1554_v25  ;;  %v1060_v15 = vadd.f32 %v3639_v8, %v1059_v45  ;;  %v3647_v53 = vpop.eup %2617  ;;  %2629 = vpow2.f32 %v1548_v14  ;;  %v1605_v25 = vpop.permute.xlu1 %1604 }
 0x433   : > { %v3649_v41 = vpop.eup %2619  ;;  %2631 = vpow2.f32 %v1051_v63  ;;  %v3694_v45 = vpop.f32.mrf.mxu1 }
 0x434   : > { %v1556_v7 = vadd.f32 %v3647_v53, %v1555_v1  ;;  %v1061_v0 = vadd.f32 %v3649_v41, %v1060_v15  ;;  %v3657_v44 = vpop.eup %2621  ;;  %2633 = vpow2.f32 %v1551_v46 }
 0x435   : > { %v3659_v57 = vpop.eup %2623  ;;  %2635 = vpow2.f32 %v1054_v11 }
 0x436   : > { %v1557_v21 = vadd.f32 %v3657_v44, %v1556_v7  ;;  %v1062_v30 = vadd.f32 %v3659_v57, %v1061_v0  ;;  %v3665_v13 = vpop.eup %2625  ;;  %2637 = vpow2.f32 %v1057_v36  ;;  %v1603_v7 = vpop.permute.xlu0 %1602 }
 0x437   : > { %v3667_v37 = vpop.eup %2627 }
 0x438   : > { %v1558_v62 = vadd.f32 %v3665_v13, %v1557_v21  ;;  %v1063_v3 = vadd.f32 %v3667_v37, %v1062_v30  ;;  %v3671_v9 = vpop.eup %2629  ;;  %v1084_v15 = vpop.permute.xlu2 %1083 }
 0x439   : > { %v3673_v49 = vpop.eup %2631 }
 0x43a   : > { %v1559_v34 = vadd.f32 %v3671_v9, %v1558_v62  ;;  %v1064_v5 = vadd.f32 %v3673_v49, %v1063_v3  ;;  %v3677_v6 = vpop.eup %2633  ;;  %v1112_v46 = vpop.permute.xlu1 %1111 }
 0x43b   : > { %v3679_v43 = vpop.eup %2635  ;;  %v3713_v21 = vpop.f32.mrf.mxu1 }
 0x43c   : > { %v1560_v10 = vadd.f32 %v3677_v6, %v1559_v34  ;;  %v1065_v59 = vadd.f32 %v3679_v43, %v1064_v5  ;;  %v3683_v2 = vpop.eup %2637 }
 0x43e   : > { %2639 = vrcp.f32 %v1560_v10  ;;  %v1066_v39 = vadd.f32 %v3683_v2, %v1065_v59 }
 0x440   : > { %2641 = vrcp.f32 %v1066_v39  ;;  %v1631_v39 = vpop.permute.xlu2 %1630 }
 0x444   : > { %v3686_v27 = vpop.eup %2639 }
 0x445   : > { %v1562_v55 = vmul.f32 %v3686_v27, %v3611_v48  ;;  %v1569_v32 = vmul.f32 %v3686_v27, %v3615_v20  ;;  %v1586_v48 = vmul.f32 %v3686_v27, %v3628_v54  ;;  %v1595_v14 = vmul.f32 %v3686_v27, %v3637_v51 }
 0x446   : > { %v3692_v22 = vpop.eup %2641  ;;  %v1612_v54 = vmul.f32 %v3686_v27, %v3647_v53  ;;  %v1621_v36 = vmul.f32 %v3686_v27, %v3657_v44 }
 0x447   : > { %v1564_v61 = vrot.slane %v1562_v55, 4  ;;  %v1571_v40 = vrot.slane %v1569_v32, 4  ;;  %v1068_v31 = vmul.f32 %v3692_v22, %v3621_v33  ;;  %v1076_v58 = vmul.f32 %v3692_v22, %v3625_v26 }
 0x448   : > { %v1588_v47 = vrot.slane %v1586_v48, 4  ;;  %v1093_v33 = vmul.f32 %v3692_v22, %v3639_v8  ;;  %v1597_v8 = vrot.slane %v1595_v14, 4  ;;  %v1614_v34 = vrot.slane %v1612_v54, 4 }
 0x449   : > { %v1566_v1 = vsel %vm1072_vm2, %v1562_v55, %v1564_v61  ;;  %v1573_v20 = vsel %vm1072_vm2, %v1569_v32, %v1571_v40  ;;  %v1070_v28 = vrot.slane %v1068_v31, 4  ;;  %v1078_v23 = vrot.slane %v1076_v58, 4 }
 0x44a   : > { %v1568_v26 = vmul.f32 %v1566_v1, %v3309_v18  ;;  %v1583_v0 = vmul.f32 %v1579_v50, %v1573_v20  ;;  %v1567_v30 = vmul.f32 %v1566_v1, %v3305_v16  ;;  %v1582_v51 = vmul.f32 %v1577_v42, %v1573_v20 }
 0x44b   : > { %v1073_v4 = vsel %vm1072_vm2, %v1068_v31, %v1070_v28  ;;  %v1080_v63 = vsel %vm1072_vm2, %v1076_v58, %v1078_v23  ;;  %v1590_v11 = vsel %vm1072_vm2, %v1586_v48, %v1588_v47  ;;  %v1095_v29 = vrot.slane %v1093_v33, 4  ;;  %v3731_v48 = vpop.f32.mrf.mxu1 }
 0x44c   : > { %v1102_v18 = vmul.f32 %v3692_v22, %v3649_v41  ;;  %v1585_v62 = vadd.f32 %v1583_v0, %v1568_v26  ;;  %v1075_v53 = vmul.f32 %v1073_v4, %v3335_v35  ;;  %v1090_v3 = vmul.f32 %v1086_v24, %v1080_v63 }
 0x44d   : > { %v1584_v5 = vadd.f32 %v1582_v51, %v1567_v30  ;;  %v1592_v10 = vmul.f32 %v1590_v11, %v3395_v56  ;;  %v1074_v16 = vmul.f32 %v1073_v4, %v3333_v60  ;;  %v1089_v59 = vmul.f32 %v1084_v15, %v1080_v63  ;;  %v1110_v56 = vpop.permute.xlu0 %1109  ;;  %v1629_v15 = vpop.permute.xlu1 %1628 }
 0x44e   : > { %v1599_v50 = vsel %vm1072_vm2, %v1595_v14, %v1597_v8  ;;  %v1097_v42 = vsel %vm1072_vm2, %v1093_v33, %v1095_v29  ;;  %v1104_v41 = vrot.slane %v1102_v18, 4  ;;  %v1119_v35 = vmul.f32 %v3692_v22, %v3659_v57 }
 0x44f   : > { %v1594_v55 = vadd.f32 %v1592_v10, %v1585_v62  ;;  %v1092_v32 = vadd.f32 %v1090_v3, %v1075_v53  ;;  %v1591_v44 = vmul.f32 %v1590_v11, %v3383_v52  ;;  %v1623_v24 = vrot.slane %v1621_v36, 4  ;;  %v1138_v11 = vpop.permute.xlu2 %1137 }
 0x450   : > { %v1616_v61 = vsel %vm1072_vm2, %v1612_v54, %v1614_v34  ;;  %v1609_v40 = vmul.f32 %v1605_v25, %v1599_v50  ;;  %v1091_v60 = vadd.f32 %v1089_v59, %v1074_v16  ;;  %v1099_v31 = vmul.f32 %v1097_v42, %v3339_v38  ;;  %v3857_v16 = vld [vmem:[#allocation2_spill] sm:$0xff] }
 0x451   : > { %v1593_v58 = vadd.f32 %v1591_v44, %v1584_v5  ;;  %v1128_v1 = vmul.f32 %v3692_v22, %v3667_v37  ;;  %v1106_v57 = vsel %vm1072_vm2, %v1102_v18, %v1104_v41  ;;  %v1121_v20 = vrot.slane %v1119_v35, 4 }
 0x452   : > { %v1638_v52 = vmul.f32 %v3686_v27, %v3665_v13  ;;  %v1611_v28 = vadd.f32 %v1609_v40, %v1594_v55  ;;  %v1101_v23 = vadd.f32 %v1099_v31, %v1092_v32  ;;  %v1608_v47 = vmul.f32 %v1603_v7, %v1599_v50  ;;  %v3858_v55 = vld [vmem:[#allocation7_spill] sm:$0xff] }
 0x453   : > { %v1098_v25 = vmul.f32 %v1097_v42, %v3337_v12  ;;  %v1625_v38 = vsel %vm1072_vm2, %v1621_v36, %v1623_v24  ;;  %v1647_v14 = vmul.f32 %v3686_v27, %v3671_v9  ;;  %v1618_v33 = vmul.f32 %v1616_v61, %v3311_v19  ;;  %v2072_v53 = vpop.f32.mrf.mxu1 }
 0x454   : > { %v1116_v37 = vmul.f32 %v1112_v46, %v1106_v57  ;;  %v1610_v26 = vadd.f32 %v1608_v47, %v1593_v58  ;;  %v1130_v54 = vrot.slane %v1128_v1, 4  ;;  %v1123_v4 = vsel %vm1072_vm2, %v1119_v35, %v1121_v20  ;;  %v3856_v46 = vld [vmem:[#allocation4_spill] sm:$0xff]  ;;  %v3860_v20 = vld [vmem:[#allocation9_spill] sm:$0xff] }
 0x455   : > { %v1100_v0 = vadd.f32 %v1098_v25, %v1091_v60  ;;  %v1640_v63 = vrot.slane %v1638_v52, 4  ;;  %v1145_v13 = vmul.f32 %v3692_v22, %v3673_v49  ;;  %v1620_v7 = vadd.f32 %v1618_v33, %v1611_v28  ;;  %v1657_v36 = vpop.permute.xlu0 %1656  ;;  %v3861_v25 = vld [vmem:[#allocation10_spill] sm:$0xff] }
 0x456   : > { %v1118_v30 = vadd.f32 %v1116_v37, %v1101_v23  ;;  %v1617_v12 = vmul.f32 %v1616_v61, %v3307_v17  ;;  %v1115_v51 = vmul.f32 %v1110_v56, %v1106_v57  ;;  %v1649_v8 = vrot.slane %v1647_v14, 4  ;;  %v3859_v61 = vld [vmem:[#allocation6_spill] sm:$0xff]  ;;  %v3862_v37 = vld [vmem:[#allocation8_spill] sm:$0xff] }
 0x457   : > { %v1664_v19 = vmul.f32 %v3686_v27, %v3677_v6  ;;  %v1635_v9 = vmul.f32 %v1631_v39, %v1625_v38  ;;  %v1125_v29 = vmul.f32 %v1123_v4, %v3856_v46  ;;  %v1132_v3 = vsel %vm1072_vm2, %v1128_v1, %v1130_v54  ;;  %v1136_v39 = vpop.permute.xlu1 %1135  ;;  %v1655_v23 = vpop.permute.xlu2 %1654 }
 0x458   : > { %v1619_v18 = vadd.f32 %v1617_v12, %v1610_v26  ;;  %v1117_v62 = vadd.f32 %v1115_v51, %v1100_v0  ;;  %v1642_v49 = vsel %vm1072_vm2, %v1638_v52, %v1640_v63  ;;  %v1147_v34 = vrot.slane %v1145_v13, 4 }
 0x459   : > { %v1154_v17 = vmul.f32 %v3692_v22, %v3679_v43  ;;  %v1127_v5 = vadd.f32 %v1125_v29, %v1118_v30  ;;  %v1634_v10 = vmul.f32 %v1629_v15, %v1625_v38  ;;  %v1124_v59 = vmul.f32 %v1123_v4, %v3857_v16  ;;  %v2176_v29 = vld [vmem:[%s3834_s4 + $0x8] sm:$0xff]  ;;  %v2179_v16 = vld [vmem:[%s3834_s4 + $0x20] sm:$0xff] }
 0x45a   : > { %v1637_v6 = vadd.f32 %v1635_v9, %v1620_v7  ;;  %v1651_v27 = vsel %vm1072_vm2, %v1647_v14, %v1649_v8  ;;  %v1666_v50 = vrot.slane %v1664_v19, 4  ;;  %v1142_v42 = vmul.f32 %v1138_v11, %v1132_v3 }
 0x45b   : > { %v1636_v41 = vadd.f32 %v1634_v10, %v1619_v18  ;;  %v1126_v35 = vadd.f32 %v1124_v59, %v1117_v62  ;;  %v1644_v32 = vmul.f32 %v1642_v49, %v3858_v55  ;;  %v1149_v44 = vsel %vm1072_vm2, %v1145_v13, %v1147_v34  ;;  %v3863_v62 = vld [vmem:[#allocation5_spill] sm:$0xff]  ;;  %v2169_v34 = vld [vmem:[%s3833_s3] sm:$0xff]  ;;  %v2171_v59 = vld [vmem:[%s3833_s3 + $0x10] sm:$0xff] }
 0x45c   : > { %v1156_v24 = vrot.slane %v1154_v17, 4  ;;  %v1171_v43 = vmul.f32 %v3692_v22, %v3683_v2  ;;  %v1643_v56 = vmul.f32 %v1642_v49, %v3859_v61  ;;  %v1141_v40 = vmul.f32 %v1136_v39, %v1132_v3  ;;  %v3864_v49 = vld [vmem:[#allocation3_spill] sm:$0xff]  ;;  %v2175_v10 = vld [vmem:[%s3834_s4] sm:$0xff] }
 0x45d   : > { %v1646_v60 = vadd.f32 %v1644_v32, %v1637_v6  ;;  %v1144_v31 = vadd.f32 %v1142_v42, %v1127_v5  ;;  %v1661_v58 = vmul.f32 %v1657_v36, %v1651_v27  ;;  %v1151_v15 = vmul.f32 %v1149_v44, %v3860_v20  ;;  %v1164_v54 = vpop.permute.xlu0 %1163  ;;  %v2170_v5 = vld [vmem:[%s3833_s3 + $0x8] sm:$0xff]  ;;  %v2178_v6 = vld [vmem:[%s3834_s4 + $0x18] sm:$0xff] }
 0x45e   : > { %v1645_v1 = vadd.f32 %v1643_v56, %v1636_v41  ;;  %v1143_v57 = vadd.f32 %v1141_v40, %v1126_v35  ;;  %v1668_v28 = vsel %vm1072_vm2, %v1664_v19, %v1666_v50  ;;  %v1158_v47 = vsel %vm1072_vm2, %v1154_v17, %v1156_v24  ;;  %v2177_v17 = vld [vmem:[%s3834_s4 + $0x10] sm:$0xff]  ;;  %v2180_v39 = vld [vmem:[%s3834_s4 + $0x28] sm:$0xff]  ;;  %v2173_v50 = vld [vmem:[%s3833_s3 + $0x20] sm:$0xff] }
 0x45f   : > { %v2162_v38 = vrot.slane %v3861_v25, 4  ;;  %v1173_v2 = vrot.slane %v1171_v43, 4  ;;  %v1660_v22 = vmul.f32 %v1655_v23, %v1651_v27  ;;  %v1663_v33 = vadd.f32 %v1661_v58, %v1646_v60  ;;  %v1162_v12 = vpop.permute.xlu1 %1161  ;;  %v2172_v27 = vld [vmem:[%s3833_s3 + $0x18] sm:$0xff]  ;;  %v2174_v42 = vld [vmem:[%s3833_s3 + $0x28] sm:$0xff] }
 0x460   : > { %v1150_v26 = vmul.f32 %v1149_v44, %v3862_v37  ;;  %v1153_v0 = vadd.f32 %v1151_v15, %v1144_v31  ;;  %v1168_v13 = vmul.f32 %v1164_v54, %v1158_v47  ;;  %v1670_v7 = vmul.f32 %v1668_v28, %v3713_v21 }
 0x461   : > { %v1662_v30 = vadd.f32 %v1660_v22, %v1645_v1  ;;  %v2167_v51 = vsel %vm1072_vm2, %v3731_v48, %v2162_v38  ;;  %v1175_v11 = vsel %vm1072_vm2, %v1171_v43, %v1173_v2  ;;  %v1167_v8 = vmul.f32 %v1162_v12, %v1158_v47 }
 0x462   : > { %v1152_v63 = vadd.f32 %v1150_v26, %v1143_v57  ;;  %v1170_v19 = vadd.f32 %v1168_v13, %v1153_v0  ;;  %v1672_v9 = vadd.f32 %v1670_v7, %v1663_v33  ;;  %v1669_v46 = vmul.f32 %v1668_v28, %v3694_v45 }
 0x463   : > { %v2655_v3 = vmov 0   ;;  %v1176_v36 = vmul.f32 %v1175_v11, %v3864_v49 }
 0x464   : > { %v1169_v18 = vadd.f32 %v1167_v8, %v1152_v63  ;;  %v1671_v21 = vadd.f32 %v1669_v46, %v1662_v30  ;;  %2577 = vset.pattern.permute.xlu0 %v2655_v3  ;;  %2578 = vset.pattern.permute.xlu1 %v2655_v3 }
 0x465   : > { %2188 = vperm.xlu0 %2577, %v2176_v29   ;;  %2576 = vset.pattern.permute.xlu2 %v2655_v3 }
 0x466   : > { %v1178_v45 = vadd.f32 %v1176_v36, %v1169_v18  ;;  %2193 = vperm.xlu1 %2578, %v2177_v17   ;;  %2183 = vperm.xlu2 %2576, %v2175_v10  }
 0x46e   : > { %2203 = vperm.xlu1 %2578, %v2179_v16   ;;  %2198 = vperm.xlu2 %2576, %v2178_v6  }
 0x476   : > { %2208 = vperm.xlu2 %2576, %v2180_v39  }
 0x490   : > { %v2158_v52 = vpop.f32.mrf.mxu1 }
 0x491   : > { %v2165_v14 = vrot.slane %v2158_v52, 4 }
 0x493   : > { %v2168_v4 = vsel %vm1072_vm2, %v2072_v53, %v2165_v14  ;;  %v1177_v53 = vmul.f32 %v1175_v11, %v3863_v62 }
 0x494   : > { %2240 = vmatpush.msrb.mxu2 %v2168_v4 }
 0x495   : > { %v1179_v48 = vadd.f32 %v1177_v53, %v1170_v19 }
 0x496   : > { %2241 = vmatpush.msrb.mxu2 %v2167_v51 }
 0x498   : > { %2242 = vmatpush.msrb.mxu2 %v1672_v9 }
 0x49a   : > { %2243 = vmatpush.msrb.mxu2 %v1671_v21 }
 0x49c   : > { %2244 = vmatpush.msrb.mxu2 %v1179_v48 }
 0x49e   : > { %2245 = vmatpush.msrb.mxu2 %v1178_v45 }
 0x49f   : > { %2540 = vmatmul.msk.f32.vlgmr.msrb.gmra.mxu2 %vm2211_vm5, %v2169_v34 }
 0x4a7   : > { %2541 = vmatmul.msk.f32.gmra.mxu2 %vm2211_vm5, %v2170_v5 }
 0x4af   : > { %2542 = vmatmul.msk.f32.gmra.mxu2 %vm2211_vm5, %v2171_v59 }
 0x4b7   : > { %2543 = vmatmul.msk.f32.gmra.mxu2 %vm2211_vm5, %v2172_v27 }
 0x4bf   : > { %2544 = vmatmul.msk.f32.gmra.mxu2 %vm2211_vm5, %v2173_v50 }
 0x4c0   : > { %v2184_v41 = vpop.permute.xlu2 %2183 }
 0x4c7   : > { %2545 = vmatmul.msk.f32.gmra.mxu2 %vm2211_vm5, %v2174_v42 }
 0x4c8   : > { %v2199_v40 = vpop.permute.xlu2 %2198 }
 0x4d0   : > { %v2209_v20 = vpop.permute.xlu2 %2208 }
 0x4d7   : > { %v2189_v32 = vpop.permute.xlu0 %2188 }
 0x4d8   : > { %v2194_v43 = vpop.permute.xlu1 %2193 }
 0x4e0   : > { %v2204_v58 = vpop.permute.xlu1 %2203 }
 0x522   : > { %v2247_v35 = vpop.f32.mrf.mxu2 }
 0x523   : > { %v2248_v55 = vadd.f32 %v2247_v35, %v2184_v41 }
 0x525   : > { %2265 = vst.msk [vmem:[%s389_s30] sm:$0xff] %vm726_vm1, %v2248_v55 }
 0x52a   : > { %v2250_v44 = vpop.f32.mrf.mxu2 }
 0x52b   : > { %v2251_v24 = vadd.f32 %v2250_v44, %v2189_v32 }
 0x52d   : > { %2266 = vst.msk [vmem:[%s389_s30 + $0x8] sm:$0xff] %vm726_vm1, %v2251_v24 }
 0x532   : > { %v2253_v61 = vpop.f32.mrf.mxu2 }
 0x533   : > { %v2254_v56 = vadd.f32 %v2253_v61, %v2194_v43 }
 0x535   : > { %2267 = vst.msk [vmem:[%s389_s30 + $0x10] sm:$0xff] %vm726_vm1, %v2254_v56 }
 0x53a   : > { %v2256_v60 = vpop.f32.mrf.mxu2 }
 0x53b   : > { %v2257_v31 = vadd.f32 %v2256_v60, %v2199_v40 }
 0x53d   : > { %2268 = vst.msk [vmem:[%s389_s30 + $0x18] sm:$0xff] %vm726_vm1, %v2257_v31 }
 0x542   : > { %v2259_v1 = vpop.f32.mrf.mxu2 }
 0x543   : > { %v2260_v57 = vadd.f32 %v2259_v1, %v2204_v58 }
 0x545   : > { %2269 = vst.msk [vmem:[%s389_s30 + $0x20] sm:$0xff] %vm726_vm1, %v2260_v57 }
 0x54a   : > { %v2262_v15 = vpop.f32.mrf.mxu2 }
 0x54b   : > { %v2263_v52 = vadd.f32 %v2262_v15, %v2209_v20 }
 0x54d   : > { %2270 = vst.msk [vmem:[%s389_s30 + $0x28] sm:$0xff] %vm726_vm1, %v2263_v52 }
 0x54e PF: > { %s20_s13 = sadd.s32 1, %s2649_s13  }
 0x54f   : > { %p17_p5 = scmp.ge.s32.totalorder %s20_s13, 6  }
 0x551   :  { %19 = sbr.rel (!%p17_p5) target bundleno = 1 (0x1), region = 106 }

</bundles_post_ra>
